<compile_context>
chip_gen: v6e
topology: v6e:2x2x1
jax: 0.10.0
libtpu: 0.0.40
codegen_flags: <defaults>
</compile_context>

<pallas_src>
import functools
import math

import jax
import jax.numpy as jnp
from jax import lax
from jax.experimental import pallas as pl
from jax.experimental.pallas import tpu as pltpu

EPS = 1e-5  # torch.nn.LayerNorm default


# ----------------------------- in-kernel helpers -----------------------------
def _layer_norm(x, g, b):
    mu = jnp.mean(x, axis=-1, keepdims=True)
    var = jnp.mean((x - mu) ** 2, axis=-1, keepdims=True)
    return (x - mu) * lax.rsqrt(var + EPS) * g + b


def _erf(x):
    # Abramowitz & Stegun 7.1.26 polynomial, |abs err| < 1.5e-7.  Uses only
    # exp / mul / add / select which always lower in Mosaic.
    p = 0.3275911
    a1, a2, a3, a4, a5 = (0.254829592, -0.284496736, 1.421413741,
                          -1.453152027, 1.061405429)
    ax = jnp.abs(x)
    t = 1.0 / (1.0 + p * ax)
    poly = ((((a5 * t + a4) * t + a3) * t + a2) * t + a1) * t
    y = 1.0 - poly * jnp.exp(-ax * ax)
    return jnp.where(x >= 0, y, -y)


def _gelu_exact(x):
    # PyTorch activation='gelu' is the exact (erf) variant.
    return 0.5 * x * (1.0 + _erf(x * (1.0 / math.sqrt(2.0))))


# --------------------------------- kernel ------------------------------------
def encoder_layer_kernel(
    x_ref, pos_ref, few_ref, feb_ref, mask_ref,
    ln1g_ref, ln1b_ref, wqkv_ref, bqkv_ref, wo_ref, bo_ref,
    ln2g_ref, ln2b_ref, w1_ref, b1_ref, w2_ref, b2_ref,
    lnfg_ref, lnfb_ref,
    o_ref,
    x_scr,
    *, S, num_heads, out_idx,
):
    """One (sequence b, layer l) grid step of the fused EmbeddingModel forward.

    Grid: (B, num_layers); batch axis "parallel", layer axis "arbitrary".
    The residual-stream activation (S, E) of sequence b is carried across the
    layer axis in VMEM scratch `x_scr`; per-layer weights are streamed
    (double-buffered) by their BlockSpecs.
    """
    l = pl.program_id(1)
    E = few_ref.shape[1]
    H = num_heads
    bf16 = jnp.bfloat16

    # ---- l == 0: frame embedder (Linear) + positional embedding ----
    @pl.when(l == 0)
    def _():
        x0 = jnp.dot(x_ref[0], few_ref[...], preferred_element_type=jnp.float32)
        x_scr[...] = x0 + feb_ref[...] + pos_ref[...]

    x = x_scr[...]                                     # (S, E) f32 residual stream

    # ---- self-attention block: x = x + out_proj(MHA(LN1(x))) ----
    h = _layer_norm(x, ln1g_ref[0], ln1b_ref[0])
    qkv = jnp.dot(h.astype(bf16), wqkv_ref[0],
                  preferred_element_type=jnp.float32) + bqkv_ref[0]   # (S, 3E) f32
    # 1/sqrt(head_dim) already folded into the q columns of wqkv/bqkv (host).
    q = qkv[:, :E]
    k = qkv[:, E:2 * E].astype(bf16)
    v = qkv[:, 2 * E:].astype(bf16)

    # Head-batched attention with 2-D matmuls only (no per-head loop, no 4-D
    # transposes): replicate q along sublanes into H row-blocks and mask each
    # block to its own head's columns.  mask[h*S + i, e] = (e // dh == h).
    mask = mask_ref[...]                                              # (H*S, E) bf16
    q_blk = (jnp.broadcast_to(q.astype(bf16)[None], (H, S, E))
             .reshape(H * S, E) * mask)                               # (H*S, E)
    s_blk = lax.dot_general(q_blk, k, (((1,), (1,)), ((), ())),
                            preferred_element_type=jnp.float32)       # (H*S, S)
    # one softmax over all heads (plain row-wise softmax)
    s_max = jnp.max(s_blk, axis=-1, keepdims=True)
    p_un = jnp.exp(s_blk - s_max)
    p = p_un * pl.reciprocal(jnp.sum(p_un, axis=-1, keepdims=True), approx=True)
    ctx = jnp.dot(p.astype(bf16), v, preferred_element_type=jnp.float32)  # (H*S, E)
    # keep only each head's own columns, then ONE full-E out-projection
    z = jnp.dot(ctx.astype(bf16) * mask, wo_ref[0],
                preferred_element_type=jnp.float32)                   # (H*S, E)
    attn = jnp.sum(z.reshape(H, S, E), axis=0)                        # (S, E)
    x = x + attn + bo_ref[0]

    # ---- feed-forward block: x = x + W2 @ gelu(W1 @ LN2(x)) ----
    h2 = _layer_norm(x, ln2g_ref[0], ln2b_ref[0])
    f = jnp.dot(h2.astype(bf16), w1_ref[0],
                preferred_element_type=jnp.float32) + b1_ref[0]
    f = _gelu_exact(f)
    f = jnp.dot(f.astype(bf16), w2_ref[0],
                preferred_element_type=jnp.float32) + b2_ref[0]
    x = x + f
    x_scr[...] = x

    # ---- last layer: token selection (exact before per-token LN) + final LN ----
    @pl.when(l == pl.num_programs(1) - 1)
    def _():
        if out_idx is None:
            o_ref[0] = _layer_norm(x, lnfg_ref[...], lnfb_ref[...]).astype(o_ref.dtype)
        else:
            xt = x[out_idx:out_idx + 1, :]                            # (1, E) static slice
            o_ref[0] = _layer_norm(xt, lnfg_ref[...], lnfb_ref[...]).astype(o_ref.dtype)


# --------------------------------- wrapper -----------------------------------
def _const_spec(arr):
    nd = arr.ndim
    return pl.BlockSpec(arr.shape, lambda b, l, _nd=nd: (0,) * _nd)


def _per_batch_spec(arr):
    nd = arr.ndim
    return pl.BlockSpec((1,) + arr.shape[1:],
                        lambda b, l, _nd=nd: (b,) + (0,) * (_nd - 1))


def _per_layer_spec(arr):
    nd = arr.ndim
    return pl.BlockSpec((1,) + arr.shape[1:],
                        lambda b, l, _nd=nd: (l,) + (0,) * (_nd - 1))


def embedding_model_forward(x, params, *, num_heads, output_token_idx):
    """Full EmbeddingModel.forward.  x: (B, S, bp_dim) float32."""
    B, S, _bp = x.shape
    E = params["fe_w"].shape[1]
    num_layers = params["wqkv"].shape[0]
    max_len = params["pos_emb"].shape[0]
    dh = E // num_heads
    assert S <= max_len, f"sequence length {S} exceeds max_len {max_len}"
    assert E % num_heads == 0

    x_bf = x.astype(jnp.bfloat16)          # halve activation HBM->VMEM bytes
    pos = params["pos_emb"][:S]
    # head-block mask for the head-batched attention in the kernel
    row_head = jnp.arange(num_heads * S, dtype=jnp.int32) // S
    col_head = jnp.arange(E, dtype=jnp.int32) // dh
    head_mask = (row_head[:, None] == col_head[None, :]).astype(jnp.bfloat16)

    if output_token_idx is None:
        out_shape = jax.ShapeDtypeStruct((B, S, E), jnp.float32)
        out_spec = pl.BlockSpec((1, S, E), lambda b, l: (b, 0, 0))
    else:
        out_shape = jax.ShapeDtypeStruct((B, 1, E), jnp.float32)
        out_spec = pl.BlockSpec((1, 1, E), lambda b, l: (b, 0, 0))

    kern = functools.partial(
        encoder_layer_kernel, S=S, num_heads=num_heads, out_idx=output_token_idx)

    per_batch = [x_bf]
    const_head = [pos, params["fe_w"], params["fe_b"], head_mask]
    per_layer = [params[k] for k in ("ln1_g", "ln1_b", "wqkv", "bqkv", "wo", "bo",
                                     "ln2_g", "ln2_b", "w1", "b1", "w2", "b2")]
    const_tail = [params["ln_g"], params["ln_b"]]

    inputs = per_batch + const_head + per_layer + const_tail
    in_specs = ([_per_batch_spec(a) for a in per_batch]
                + [_const_spec(a) for a in const_head]
                + [_per_layer_spec(a) for a in per_layer]
                + [_const_spec(a) for a in const_tail])

    # TODO(synk): at realistic sizes, single-buffer constant-index specs
    # (pipeline_mode=pl.Buffered(1)) and set vmem_limit_bytes with v7x headroom.
    return pl.pallas_call(
        kern,
        out_shape=out_shape,
        grid=(B, num_layers),
        in_specs=in_specs,
        out_specs=out_spec,
        scratch_shapes=[pltpu.VMEM((S, E), jnp.float32)],
        compiler_params=pltpu.CompilerParams(
            dimension_semantics=("parallel", "arbitrary")),
    )(*inputs)


# ----------------------------- parameter init --------------------------------
def init_params(key, *, bp_dim, emb_dim, hidden_dim, num_layers, max_len):
    """f32 params; per-layer tensors stacked along a leading L axis."""
    keys = iter(jax.random.split(key, 3 + num_layers * 6))

    def lin_w(in_f, out_f):
        b = 1.0 / math.sqrt(in_f)
        return jax.random.uniform(next(keys), (in_f, out_f), jnp.float32, -b, b)

    def lin_b(in_f, out_f):
        b = 1.0 / math.sqrt(in_f)
        return jax.random.uniform(next(keys), (1, out_f), jnp.float32, -b, b)

    p = {
        "fe_w": lin_w(bp_dim, emb_dim),
        "fe_b": lin_b(bp_dim, emb_dim),
        "pos_emb": jax.random.uniform(
            next(keys), (max_len, emb_dim), jnp.float32,
            -1.0 / math.sqrt(emb_dim), 1.0 / math.sqrt(emb_dim)),
        "ln_g": jnp.ones((1, emb_dim), jnp.float32),
        "ln_b": jnp.zeros((1, emb_dim), jnp.float32),
    }
    layers = {k: [] for k in ("ln1_g", "ln1_b", "wqkv", "bqkv", "wo", "bo",
                              "ln2_g", "ln2_b", "w1", "b1", "w2", "b2")}
    for _ in range(num_layers):
        layers["ln1_g"].append(jnp.ones((1, emb_dim), jnp.float32))
        layers["ln1_b"].append(jnp.zeros((1, emb_dim), jnp.float32))
        layers["wqkv"].append(lin_w(emb_dim, 3 * emb_dim))
        layers["bqkv"].append(jnp.zeros((1, 3 * emb_dim), jnp.float32))
        layers["wo"].append(lin_w(emb_dim, emb_dim))
        layers["bo"].append(jnp.zeros((1, emb_dim), jnp.float32))
        layers["ln2_g"].append(jnp.ones((1, emb_dim), jnp.float32))
        layers["ln2_b"].append(jnp.zeros((1, emb_dim), jnp.float32))
        layers["w1"].append(lin_w(emb_dim, hidden_dim))
        layers["b1"].append(lin_b(emb_dim, hidden_dim))
        layers["w2"].append(lin_w(hidden_dim, emb_dim))
        layers["b2"].append(lin_b(hidden_dim, emb_dim))
    for k, v in layers.items():
        p[k] = jnp.stack(v, axis=0)
    return p


def pack_params(p, *, num_heads):
    """Cast MXU weights to bf16 and fold 1/sqrt(head_dim) into the q columns."""
    E = p["fe_w"].shape[1]
    dh = E // num_heads
    scale = 1.0 / math.sqrt(dh)
    q = dict(p)
    q["wqkv"] = (p["wqkv"].at[:, :, :E].multiply(scale)).astype(jnp.bfloat16)
    q["bqkv"] = p["bqkv"].at[:, :, :E].multiply(scale)
    for name in ("fe_w", "wo", "w1", "w2"):
        q[name] = p[name].astype(jnp.bfloat16)
    return q


# ----------------------------- pure-JAX reference -----------------------------
def reference_forward(x, p, *, num_heads, output_token_idx):
    """Non-Pallas reference of the same math (for verification only)."""
    B, S, _ = x.shape
    E = p["fe_w"].shape[1]
    dh = E // num_heads
    L = p["wqkv"].shape[0]
    f32 = lambda a: a.astype(jnp.float32)

    def ln(a, g, b):
        mu = a.mean(-1, keepdims=True)
        var = ((a - mu) ** 2).mean(-1, keepdims=True)
        return (a - mu) * lax.rsqrt(var + EPS) * g + b

    h = x @ f32(p["fe_w"]) + p["fe_b"] + p["pos_emb"][:S]
    for l in range(L):
        y = ln(h, p["ln1_g"][l], p["ln1_b"][l])
        qkv = y @ f32(p["wqkv"][l]) + p["bqkv"][l]
        q = qkv[..., :E].reshape(B, S, num_heads, dh)
        k = qkv[..., E:2 * E].reshape(B, S, num_heads, dh)
        v = qkv[..., 2 * E:].reshape(B, S, num_heads, dh)
        s = jnp.einsum("bqhd,bkhd->bhqk", q, k)
        attn = jnp.einsum("bhqk,bkhd->bqhd", jax.nn.softmax(s, -1), v)
        h = h + attn.reshape(B, S, E) @ f32(p["wo"][l]) + p["bo"][l]
        y2 = ln(h, p["ln2_g"][l], p["ln2_b"][l])
        f = y2 @ f32(p["w1"][l]) + p["b1"][l]
        f = 0.5 * f * (1.0 + lax.erf(f / math.sqrt(2.0)))
        h = h + f @ f32(p["w2"][l]) + p["b2"][l]
    h = ln(h, p["ln_g"], p["ln_b"])
    if output_token_idx is None:
        return h
    return h[:, output_token_idx:output_token_idx + 1, :]


# ------------------------------------ main ------------------------------------
if __name__ == "__main__":
    B, S = 2, 8
    bp_dim, emb_dim, hidden_dim = 16, 32, 64
    num_heads, num_layers, max_len = 4, 2, 16
    output_token_idx = 0

    key = jax.random.PRNGKey(0)
    k_x, k_p = jax.random.split(key)
    x = jax.random.normal(k_x, (B, S, bp_dim), jnp.float32)
    params = pack_params(
        init_params(k_p, bp_dim=bp_dim, emb_dim=emb_dim, hidden_dim=hidden_dim,
                    num_layers=num_layers, max_len=max_len),
        num_heads=num_heads,
    )

    fwd = jax.jit(functools.partial(
        embedding_model_forward, num_heads=num_heads,
        output_token_idx=output_token_idx))
    out = jax.block_until_ready(fwd(x, params))

    assert out.shape == (B, 1, emb_dim), out.shape
    assert bool(jnp.all(jnp.isfinite(out)))

    ref = jax.jit(functools.partial(
        reference_forward, num_heads=num_heads,
        output_token_idx=output_token_idx))(x, params)
    max_err = float(jnp.max(jnp.abs(out - ref)))
    assert max_err < 1e-1, f"max |kernel - reference| = {max_err}"

    print("KERNEL_OK")
</pallas_src>

<mosaic_0001>
module attributes {stable_mosaic.version = 11 : i64} {
  func.func @encoder_layer_kernel(%arg0: i32, %arg1: i32, %arg2: memref<1x8x16xbf16, #tpu.memory_space<vmem>>, %arg3: memref<8x32xf32, #tpu.memory_space<vmem>>, %arg4: memref<16x32xbf16, #tpu.memory_space<vmem>>, %arg5: memref<1x32xf32, #tpu.memory_space<vmem>>, %arg6: memref<32x32xbf16, #tpu.memory_space<vmem>>, %arg7: memref<1x1x32xf32, #tpu.memory_space<vmem>>, %arg8: memref<1x1x32xf32, #tpu.memory_space<vmem>>, %arg9: memref<1x32x96xbf16, #tpu.memory_space<vmem>>, %arg10: memref<1x1x96xf32, #tpu.memory_space<vmem>>, %arg11: memref<1x32x32xbf16, #tpu.memory_space<vmem>>, %arg12: memref<1x1x32xf32, #tpu.memory_space<vmem>>, %arg13: memref<1x1x32xf32, #tpu.memory_space<vmem>>, %arg14: memref<1x1x32xf32, #tpu.memory_space<vmem>>, %arg15: memref<1x32x64xbf16, #tpu.memory_space<vmem>>, %arg16: memref<1x1x64xf32, #tpu.memory_space<vmem>>, %arg17: memref<1x64x32xbf16, #tpu.memory_space<vmem>>, %arg18: memref<1x1x32xf32, #tpu.memory_space<vmem>>, %arg19: memref<1x32xf32, #tpu.memory_space<vmem>>, %arg20: memref<1x32xf32, #tpu.memory_space<vmem>>, %arg21: memref<1x1x32xf32, #tpu.memory_space<vmem>>, %arg22: memref<8x32xf32, #tpu.memory_space<vmem>>) attributes {dimension_semantics = [#tpu.dimension_semantics<parallel>, #tpu.dimension_semantics<arbitrary>], iteration_bounds = array<i64: 2, 2>, scalar_prefetch = 0 : i64, scratch_operands = 1 : i64, tpu.core_type = #tpu.core_type<tc>, window_params = [{transform_indices = @transform_0, window_bounds = array<i64: 1, 8, 16>}, {pipeline_mode = #tpu.pipeline_mode<synchronous>, transform_indices = @transform_1, window_bounds = array<i64: 8, 32>}, {pipeline_mode = #tpu.pipeline_mode<synchronous>, transform_indices = @transform_2, window_bounds = array<i64: 16, 32>}, {pipeline_mode = #tpu.pipeline_mode<synchronous>, transform_indices = @transform_3, window_bounds = array<i64: 1, 32>}, {pipeline_mode = #tpu.pipeline_mode<synchronous>, transform_indices = @transform_4, window_bounds = array<i64: 32, 32>}, {transform_indices = @transform_5, window_bounds = array<i64: 1, 1, 32>}, {transform_indices = @transform_6, window_bounds = array<i64: 1, 1, 32>}, {transform_indices = @transform_7, window_bounds = array<i64: 1, 32, 96>}, {transform_indices = @transform_8, window_bounds = array<i64: 1, 1, 96>}, {transform_indices = @transform_9, window_bounds = array<i64: 1, 32, 32>}, {transform_indices = @transform_10, window_bounds = array<i64: 1, 1, 32>}, {transform_indices = @transform_11, window_bounds = array<i64: 1, 1, 32>}, {transform_indices = @transform_12, window_bounds = array<i64: 1, 1, 32>}, {transform_indices = @transform_13, window_bounds = array<i64: 1, 32, 64>}, {transform_indices = @transform_14, window_bounds = array<i64: 1, 1, 64>}, {transform_indices = @transform_15, window_bounds = array<i64: 1, 64, 32>}, {transform_indices = @transform_16, window_bounds = array<i64: 1, 1, 32>}, {pipeline_mode = #tpu.pipeline_mode<synchronous>, transform_indices = @transform_17, window_bounds = array<i64: 1, 32>}, {pipeline_mode = #tpu.pipeline_mode<synchronous>, transform_indices = @transform_18, window_bounds = array<i64: 1, 32>}, {transform_indices = @transform_19, window_bounds = array<i64: 1, 1, 32>}]} {
    %c0_i32 = arith.constant 0 : i32
    %0 = arith.cmpi eq, %arg1, %c0_i32 : i32
    %1 = arith.extui %0 : i1 to i32
    %c0_i32_0 = arith.constant 0 : i32
    %2 = arith.cmpi ne, %1, %c0_i32_0 : i32
    scf.if %2 {
      %c0_76 = arith.constant 0 : index
      %c0_77 = arith.constant 0 : index
      %c0_78 = arith.constant 0 : index
      %162 = vector.load %arg2[%c0_76, %c0_77, %c0_78] : memref<1x8x16xbf16, #tpu.memory_space<vmem>>, vector<1x8x16xbf16>
      %163 = vector.shape_cast %162 : vector<1x8x16xbf16> to vector<8x16xbf16>
      %c0_79 = arith.constant 0 : index
      %c0_80 = arith.constant 0 : index
      %164 = vector.load %arg4[%c0_79, %c0_80] : memref<16x32xbf16, #tpu.memory_space<vmem>>, vector<16x32xbf16>
      %cst_81 = arith.constant dense<0.000000e+00> : vector<8x32xf32>
      %165 = tpu.matmul %163, %164, %cst_81 {dimension_numbers = #tpu.dot_dimension_numbers<[1], [0], [0], [1], [0, 0, 1, 1], [], []>} : vector<8x16xbf16>, vector<16x32xbf16>, vector<8x32xf32> -> vector<8x32xf32>
      %c0_82 = arith.constant 0 : index
      %c0_83 = arith.constant 0 : index
      %166 = vector.load %arg5[%c0_82, %c0_83] : memref<1x32xf32, #tpu.memory_space<vmem>>, vector<1x32xf32>
      %167 = vector.broadcast %166 : vector<1x32xf32> to vector<8x32xf32>
      %168 = arith.addf %165, %167 : vector<8x32xf32>
      %c0_84 = arith.constant 0 : index
      %c0_85 = arith.constant 0 : index
      %169 = vector.load %arg3[%c0_84, %c0_85] : memref<8x32xf32, #tpu.memory_space<vmem>>, vector<8x32xf32>
      %170 = arith.addf %168, %169 : vector<8x32xf32>
      %c0_86 = arith.constant 0 : index
      %c0_87 = arith.constant 0 : index
      %171 = vector.load %arg22[%c0_86, %c0_87] : memref<8x32xf32, #tpu.memory_space<vmem>>, vector<8x32xf32>
      tpu.vector_store %arg22[%c0_86, %c0_87], %170 {strides = array<i32>} : memref<8x32xf32, #tpu.memory_space<vmem>>, vector<8x32xf32>,
    } else {
    }
    %c0 = arith.constant 0 : index
    %c0_1 = arith.constant 0 : index
    %3 = vector.load %arg22[%c0, %c0_1] : memref<8x32xf32, #tpu.memory_space<vmem>>, vector<8x32xf32>
    %c0_2 = arith.constant 0 : index
    %c0_3 = arith.constant 0 : index
    %c0_4 = arith.constant 0 : index
    %4 = vector.load %arg7[%c0_2, %c0_3, %c0_4] : memref<1x1x32xf32, #tpu.memory_space<vmem>>, vector<1x1x32xf32>
    %5 = vector.shape_cast %4 : vector<1x1x32xf32> to vector<1x32xf32>
    %c0_5 = arith.constant 0 : index
    %c0_6 = arith.constant 0 : index
    %c0_7 = arith.constant 0 : index
    %6 = vector.load %arg8[%c0_5, %c0_6, %c0_7] : memref<1x1x32xf32, #tpu.memory_space<vmem>>, vector<1x1x32xf32>
    %7 = vector.shape_cast %6 : vector<1x1x32xf32> to vector<1x32xf32>
    %cst = arith.constant dense<0.000000e+00> : vector<8xf32>
    %8 = vector.multi_reduction <add>, %3, %cst [1] : vector<8x32xf32> to vector<8xf32>
    %9 = vector.shape_cast %8 : vector<8xf32> to vector<8x1xf32>
    %cst_8 = arith.constant 3.200000e+01 : f32
    %10 = vector.broadcast %cst_8 : f32 to vector<8x1xf32>
    %11 = arith.divf %9, %10 : vector<8x1xf32>
    %12 = vector.broadcast %11 : vector<8x1xf32> to vector<8x32xf32>
    %13 = arith.subf %3, %12 : vector<8x32xf32>
    %14 = arith.mulf %13, %13 : vector<8x32xf32>
    %cst_9 = arith.constant dense<0.000000e+00> : vector<8xf32>
    %15 = vector.multi_reduction <add>, %14, %cst_9 [1] : vector<8x32xf32> to vector<8xf32>
    %16 = vector.shape_cast %15 : vector<8xf32> to vector<8x1xf32>
    %cst_10 = arith.constant 3.200000e+01 : f32
    %17 = vector.broadcast %cst_10 : f32 to vector<8x1xf32>
    %18 = arith.divf %16, %17 : vector<8x1xf32>
    %19 = vector.broadcast %11 : vector<8x1xf32> to vector<8x32xf32>
    %20 = arith.subf %3, %19 : vector<8x32xf32>
    %cst_11 = arith.constant 9.99999974E-6 : f32
    %21 = vector.broadcast %cst_11 : f32 to vector<8x1xf32>
    %22 = arith.addf %18, %21 : vector<8x1xf32>
    %23 = math.rsqrt %22 : vector<8x1xf32>
    %24 = vector.broadcast %23 : vector<8x1xf32> to vector<8x32xf32>
    %25 = arith.mulf %20, %24 : vector<8x32xf32>
    %26 = vector.broadcast %5 : vector<1x32xf32> to vector<8x32xf32>
    %27 = arith.mulf %25, %26 : vector<8x32xf32>
    %28 = vector.broadcast %7 : vector<1x32xf32> to vector<8x32xf32>
    %29 = arith.addf %27, %28 : vector<8x32xf32>
    %30 = arith.truncf %29 : vector<8x32xf32> to vector<8x32xbf16>
    %c0_12 = arith.constant 0 : index
    %c0_13 = arith.constant 0 : index
    %c0_14 = arith.constant 0 : index
    %31 = vector.load %arg9[%c0_12, %c0_13, %c0_14] : memref<1x32x96xbf16, #tpu.memory_space<vmem>>, vector<1x32x96xbf16>
    %32 = vector.shape_cast %31 : vector<1x32x96xbf16> to vector<32x96xbf16>
    %cst_15 = arith.constant dense<0.000000e+00> : vector<8x96xf32>
    %33 = tpu.matmul %30, %32, %cst_15 {dimension_numbers = #tpu.dot_dimension_numbers<[1], [0], [0], [1], [0, 0, 1, 1], [], []>} : vector<8x32xbf16>, vector<32x96xbf16>, vector<8x96xf32> -> vector<8x96xf32>
    %c0_16 = arith.constant 0 : index
    %c0_17 = arith.constant 0 : index
    %c0_18 = arith.constant 0 : index
    %34 = vector.load %arg10[%c0_16, %c0_17, %c0_18] : memref<1x1x96xf32, #tpu.memory_space<vmem>>, vector<1x1x96xf32>
    %35 = vector.shape_cast %34 : vector<1x1x96xf32> to vector<1x96xf32>
    %36 = vector.broadcast %35 : vector<1x96xf32> to vector<8x96xf32>
    %37 = arith.addf %33, %36 : vector<8x96xf32>
    %38 = vector.extract_strided_slice %37 {offsets = [0, 0], sizes = [8, 32], strides = [1, 1]} : vector<8x96xf32> to vector<8x32xf32>
    %39 = vector.extract_strided_slice %37 {offsets = [0, 32], sizes = [8, 32], strides = [1, 1]} : vector<8x96xf32> to vector<8x32xf32>
    %40 = arith.truncf %39 : vector<8x32xf32> to vector<8x32xbf16>
    %41 = vector.extract_strided_slice %37 {offsets = [0, 64], sizes = [8, 32], strides = [1, 1]} : vector<8x96xf32> to vector<8x32xf32>
    %42 = arith.truncf %41 : vector<8x32xf32> to vector<8x32xbf16>
    %c0_19 = arith.constant 0 : index
    %c0_20 = arith.constant 0 : index
    %43 = vector.load %arg6[%c0_19, %c0_20] : memref<32x32xbf16, #tpu.memory_space<vmem>>, vector<32x32xbf16>
    %44 = arith.truncf %38 : vector<8x32xf32> to vector<8x32xbf16>
    %45 = vector.shape_cast %44 : vector<8x32xbf16> to vector<1x8x32xbf16>
    %46 = vector.shape_cast %45 : vector<1x8x32xbf16> to vector<1x8x32xbf16>
    %47 = vector.broadcast %46 : vector<1x8x32xbf16> to vector<4x8x32xbf16>
    %48 = vector.shape_cast %47 : vector<4x8x32xbf16> to vector<32x32xbf16>
    %49 = arith.mulf %48, %43 : vector<32x32xbf16>
    %cst_21 = arith.constant dense<0.000000e+00> : vector<32x8xf32>
    %50 = tpu.matmul %49, %40, %cst_21 {dimension_numbers = #tpu.dot_dimension_numbers<[1], [1], [0], [0], [0, 0, 1, 0], [], []>} : vector<32x32xbf16>, vector<8x32xbf16>, vector<32x8xf32> -> vector<32x8xf32>
    %cst_22 = arith.constant dense<0xFF800000> : vector<32xf32>
    %51 = vector.multi_reduction <maximumf>, %50, %cst_22 [1] : vector<32x8xf32> to vector<32xf32>
    %52 = vector.shape_cast %51 : vector<32xf32> to vector<32x1xf32>
    %53 = vector.broadcast %52 : vector<32x1xf32> to vector<32x8xf32>
    %54 = arith.subf %50, %53 : vector<32x8xf32>
    %55 = math.exp %54 : vector<32x8xf32>
    %cst_23 = arith.constant dense<0.000000e+00> : vector<32xf32>
    %56 = vector.multi_reduction <add>, %55, %cst_23 [1] : vector<32x8xf32> to vector<32xf32>
    %57 = vector.shape_cast %56 : vector<32xf32> to vector<32x1xf32>
    %58 = tpu.reciprocal %57 {approx = true} : vector<32x1xf32> -> vector<32x1xf32>
    %59 = vector.broadcast %58 : vector<32x1xf32> to vector<32x8xf32>
    %60 = arith.mulf %55, %59 : vector<32x8xf32>
    %61 = arith.truncf %60 : vector<32x8xf32> to vector<32x8xbf16>
    %cst_24 = arith.constant dense<0.000000e+00> : vector<32x32xf32>
    %62 = tpu.matmul %61, %42, %cst_24 {dimension_numbers = #tpu.dot_dimension_numbers<[1], [0], [0], [1], [0, 0, 1, 1], [], []>} : vector<32x8xbf16>, vector<8x32xbf16>, vector<32x32xf32> -> vector<32x32xf32>
    %63 = arith.truncf %62 : vector<32x32xf32> to vector<32x32xbf16>
    %64 = arith.mulf %63, %43 : vector<32x32xbf16>
    %c0_25 = arith.constant 0 : index
    %c0_26 = arith.constant 0 : index
    %c0_27 = arith.constant 0 : index
    %65 = vector.load %arg11[%c0_25, %c0_26, %c0_27] : memref<1x32x32xbf16, #tpu.memory_space<vmem>>, vector<1x32x32xbf16>
    %66 = vector.shape_cast %65 : vector<1x32x32xbf16> to vector<32x32xbf16>
    %cst_28 = arith.constant dense<0.000000e+00> : vector<32x32xf32>
    %67 = tpu.matmul %64, %66, %cst_28 {dimension_numbers = #tpu.dot_dimension_numbers<[1], [0], [0], [1], [0, 0, 1, 1], [], []>} : vector<32x32xbf16>, vector<32x32xbf16>, vector<32x32xf32> -> vector<32x32xf32>
    %68 = vector.shape_cast %67 : vector<32x32xf32> to vector<4x8x32xf32>
    %cst_29 = arith.constant dense<0.000000e+00> : vector<8x32xf32>
    %69 = vector.multi_reduction <add>, %68, %cst_29 [0] : vector<4x8x32xf32> to vector<8x32xf32>
    %70 = arith.addf %3, %69 : vector<8x32xf32>
    %c0_30 = arith.constant 0 : index
    %c0_31 = arith.constant 0 : index
    %c0_32 = arith.constant 0 : index
    %71 = vector.load %arg12[%c0_30, %c0_31, %c0_32] : memref<1x1x32xf32, #tpu.memory_space<vmem>>, vector<1x1x32xf32>
    %72 = vector.shape_cast %71 : vector<1x1x32xf32> to vector<1x32xf32>
    %73 = vector.broadcast %72 : vector<1x32xf32> to vector<8x32xf32>
    %74 = arith.addf %70, %73 : vector<8x32xf32>
    %c0_33 = arith.constant 0 : index
    %c0_34 = arith.constant 0 : index
    %c0_35 = arith.constant 0 : index
    %75 = vector.load %arg13[%c0_33, %c0_34, %c0_35] : memref<1x1x32xf32, #tpu.memory_space<vmem>>, vector<1x1x32xf32>
    %76 = vector.shape_cast %75 : vector<1x1x32xf32> to vector<1x32xf32>
    %c0_36 = arith.constant 0 : index
    %c0_37 = arith.constant 0 : index
    %c0_38 = arith.constant 0 : index
    %77 = vector.load %arg14[%c0_36, %c0_37, %c0_38] : memref<1x1x32xf32, #tpu.memory_space<vmem>>, vector<1x1x32xf32>
    %78 = vector.shape_cast %77 : vector<1x1x32xf32> to vector<1x32xf32>
    %cst_39 = arith.constant dense<0.000000e+00> : vector<8xf32>
    %79 = vector.multi_reduction <add>, %74, %cst_39 [1] : vector<8x32xf32> to vector<8xf32>
    %80 = vector.shape_cast %79 : vector<8xf32> to vector<8x1xf32>
    %cst_40 = arith.constant 3.200000e+01 : f32
    %81 = vector.broadcast %cst_40 : f32 to vector<8x1xf32>
    %82 = arith.divf %80, %81 : vector<8x1xf32>
    %83 = vector.broadcast %82 : vector<8x1xf32> to vector<8x32xf32>
    %84 = arith.subf %74, %83 : vector<8x32xf32>
    %85 = arith.mulf %84, %84 : vector<8x32xf32>
    %cst_41 = arith.constant dense<0.000000e+00> : vector<8xf32>
    %86 = vector.multi_reduction <add>, %85, %cst_41 [1] : vector<8x32xf32> to vector<8xf32>
    %87 = vector.shape_cast %86 : vector<8xf32> to vector<8x1xf32>
    %cst_42 = arith.constant 3.200000e+01 : f32
    %88 = vector.broadcast %cst_42 : f32 to vector<8x1xf32>
    %89 = arith.divf %87, %88 : vector<8x1xf32>
    %90 = vector.broadcast %82 : vector<8x1xf32> to vector<8x32xf32>
    %91 = arith.subf %74, %90 : vector<8x32xf32>
    %cst_43 = arith.constant 9.99999974E-6 : f32
    %92 = vector.broadcast %cst_43 : f32 to vector<8x1xf32>
    %93 = arith.addf %89, %92 : vector<8x1xf32>
    %94 = math.rsqrt %93 : vector<8x1xf32>
    %95 = vector.broadcast %94 : vector<8x1xf32> to vector<8x32xf32>
    %96 = arith.mulf %91, %95 : vector<8x32xf32>
    %97 = vector.broadcast %76 : vector<1x32xf32> to vector<8x32xf32>
    %98 = arith.mulf %96, %97 : vector<8x32xf32>
    %99 = vector.broadcast %78 : vector<1x32xf32> to vector<8x32xf32>
    %100 = arith.addf %98, %99 : vector<8x32xf32>
    %101 = arith.truncf %100 : vector<8x32xf32> to vector<8x32xbf16>
    %c0_44 = arith.constant 0 : index
    %c0_45 = arith.constant 0 : index
    %c0_46 = arith.constant 0 : index
    %102 = vector.load %arg15[%c0_44, %c0_45, %c0_46] : memref<1x32x64xbf16, #tpu.memory_space<vmem>>, vector<1x32x64xbf16>
    %103 = vector.shape_cast %102 : vector<1x32x64xbf16> to vector<32x64xbf16>
    %cst_47 = arith.constant dense<0.000000e+00> : vector<8x64xf32>
    %104 = tpu.matmul %101, %103, %cst_47 {dimension_numbers = #tpu.dot_dimension_numbers<[1], [0], [0], [1], [0, 0, 1, 1], [], []>} : vector<8x32xbf16>, vector<32x64xbf16>, vector<8x64xf32> -> vector<8x64xf32>
    %c0_48 = arith.constant 0 : index
    %c0_49 = arith.constant 0 : index
    %c0_50 = arith.constant 0 : index
    %105 = vector.load %arg16[%c0_48, %c0_49, %c0_50] : memref<1x1x64xf32, #tpu.memory_space<vmem>>, vector<1x1x64xf32>
    %106 = vector.shape_cast %105 : vector<1x1x64xf32> to vector<1x64xf32>
    %107 = vector.broadcast %106 : vector<1x64xf32> to vector<8x64xf32>
    %108 = arith.addf %104, %107 : vector<8x64xf32>
    %cst_51 = arith.constant 5.000000e-01 : f32
    %109 = vector.broadcast %cst_51 : f32 to vector<8x64xf32>
    %110 = arith.mulf %109, %108 : vector<8x64xf32>
    %cst_52 = arith.constant 0.707106769 : f32
    %111 = vector.broadcast %cst_52 : f32 to vector<8x64xf32>
    %112 = arith.mulf %108, %111 : vector<8x64xf32>
    %113 = math.absf %112 : vector<8x64xf32>
    %cst_53 = arith.constant 0.327591091 : f32
    %114 = vector.broadcast %cst_53 : f32 to vector<8x64xf32>
    %115 = arith.mulf %114, %113 : vector<8x64xf32>
    %cst_54 = arith.constant 1.000000e+00 : f32
    %116 = vector.broadcast %cst_54 : f32 to vector<8x64xf32>
    %117 = arith.addf %116, %115 : vector<8x64xf32>
    %cst_55 = arith.constant 1.000000e+00 : f32
    %118 = vector.broadcast %cst_55 : f32 to vector<8x64xf32>
    %119 = arith.divf %118, %117 : vector<8x64xf32>
    %cst_56 = arith.constant 1.06140542 : f32
    %120 = vector.broadcast %cst_56 : f32 to vector<8x64xf32>
    %121 = arith.mulf %120, %119 : vector<8x64xf32>
    %cst_57 = arith.constant -1.45315206 : f32
    %122 = vector.broadcast %cst_57 : f32 to vector<8x64xf32>
    %123 = arith.addf %121, %122 : vector<8x64xf32>
    %124 = arith.mulf %123, %119 : vector<8x64xf32>
    %cst_58 = arith.constant 1.42141378 : f32
    %125 = vector.broadcast %cst_58 : f32 to vector<8x64xf32>
    %126 = arith.addf %124, %125 : vector<8x64xf32>
    %127 = arith.mulf %126, %119 : vector<8x64xf32>
    %cst_59 = arith.constant -0.284496725 : f32
    %128 = vector.broadcast %cst_59 : f32 to vector<8x64xf32>
    %129 = arith.addf %127, %128 : vector<8x64xf32>
    %130 = arith.mulf %129, %119 : vector<8x64xf32>
    %cst_60 = arith.constant 0.254829586 : f32
    %131 = vector.broadcast %cst_60 : f32 to vector<8x64xf32>
    %132 = arith.addf %130, %131 : vector<8x64xf32>
    %133 = arith.mulf %132, %119 : vector<8x64xf32>
    %cst_61 = arith.constant 0.000000e+00 : f32
    %134 = vector.broadcast %cst_61 : f32 to vector<8x64xf32>
    %135 = arith.subf %134, %113 : vector<8x64xf32>
    %136 = arith.mulf %135, %113 : vector<8x64xf32>
    %137 = math.exp %136 : vector<8x64xf32>
    %138 = arith.mulf %133, %137 : vector<8x64xf32>
    %cst_62 = arith.constant 1.000000e+00 : f32
    %139 = vector.broadcast %cst_62 : f32 to vector<8x64xf32>
    %140 = arith.subf %139, %138 : vector<8x64xf32>
    %cst_63 = arith.constant 0.000000e+00 : f32
    %141 = vector.broadcast %cst_63 : f32 to vector<8x64xf32>
    %142 = arith.cmpf oge, %112, %141 : vector<8x64xf32>
    %cst_64 = arith.constant 0.000000e+00 : f32
    %143 = vector.broadcast %cst_64 : f32 to vector<8x64xf32>
    %144 = arith.subf %143, %140 : vector<8x64xf32>
    %145 = arith.select %142, %140, %144 : vector<8x64xi1>, vector<8x64xf32>
    %cst_65 = arith.constant 1.000000e+00 : f32
    %146 = vector.broadcast %cst_65 : f32 to vector<8x64xf32>
    %147 = arith.addf %146, %145 : vector<8x64xf32>
    %148 = arith.mulf %110, %147 : vector<8x64xf32>
    %149 = arith.truncf %148 : vector<8x64xf32> to vector<8x64xbf16>
    %c0_66 = arith.constant 0 : index
    %c0_67 = arith.constant 0 : index
    %c0_68 = arith.constant 0 : index
    %150 = vector.load %arg17[%c0_66, %c0_67, %c0_68] : memref<1x64x32xbf16, #tpu.memory_space<vmem>>, vector<1x64x32xbf16>
    %151 = vector.shape_cast %150 : vector<1x64x32xbf16> to vector<64x32xbf16>
    %cst_69 = arith.constant dense<0.000000e+00> : vector<8x32xf32>
    %152 = tpu.matmul %149, %151, %cst_69 {dimension_numbers = #tpu.dot_dimension_numbers<[1], [0], [0], [1], [0, 0, 1, 1], [], []>} : vector<8x64xbf16>, vector<64x32xbf16>, vector<8x32xf32> -> vector<8x32xf32>
    %c0_70 = arith.constant 0 : index
    %c0_71 = arith.constant 0 : index
    %c0_72 = arith.constant 0 : index
    %153 = vector.load %arg18[%c0_70, %c0_71, %c0_72] : memref<1x1x32xf32, #tpu.memory_space<vmem>>, vector<1x1x32xf32>
    %154 = vector.shape_cast %153 : vector<1x1x32xf32> to vector<1x32xf32>
    %155 = vector.broadcast %154 : vector<1x32xf32> to vector<8x32xf32>
    %156 = arith.addf %152, %155 : vector<8x32xf32>
    %157 = arith.addf %74, %156 : vector<8x32xf32>
    %c0_73 = arith.constant 0 : index
    %c0_74 = arith.constant 0 : index
    %158 = vector.load %arg22[%c0_73, %c0_74] : memref<8x32xf32, #tpu.memory_space<vmem>>, vector<8x32xf32>
    tpu.vector_store %arg22[%c0_73, %c0_74], %157 {strides = array<i32>} : memref<8x32xf32, #tpu.memory_space<vmem>>, vector<8x32xf32>,
    %c1_i32 = arith.constant 1 : i32
    %159 = arith.cmpi eq, %arg1, %c1_i32 : i32
    %160 = arith.extui %159 : i1 to i32
    %c0_i32_75 = arith.constant 0 : i32
    %161 = arith.cmpi ne, %160, %c0_i32_75 : i32
    scf.if %161 {
      %162 = vector.extract_strided_slice %157 {offsets = [0, 0], sizes = [1, 32], strides = [1, 1]} : vector<8x32xf32> to vector<1x32xf32>
      %c0_76 = arith.constant 0 : index
      %c0_77 = arith.constant 0 : index
      %163 = vector.load %arg19[%c0_76, %c0_77] : memref<1x32xf32, #tpu.memory_space<vmem>>, vector<1x32xf32>
      %c0_78 = arith.constant 0 : index
      %c0_79 = arith.constant 0 : index
      %164 = vector.load %arg20[%c0_78, %c0_79] : memref<1x32xf32, #tpu.memory_space<vmem>>, vector<1x32xf32>
      %cst_80 = arith.constant dense<0.000000e+00> : vector<1xf32>
      %165 = vector.multi_reduction <add>, %162, %cst_80 [1] : vector<1x32xf32> to vector<1xf32>
      %166 = vector.shape_cast %165 : vector<1xf32> to vector<1x1xf32>
      %cst_81 = arith.constant 3.200000e+01 : f32
      %167 = vector.broadcast %cst_81 : f32 to vector<1x1xf32>
      %168 = arith.divf %166, %167 : vector<1x1xf32>
      %169 = vector.broadcast %168 : vector<1x1xf32> to vector<1x32xf32>
      %170 = arith.subf %162, %169 : vector<1x32xf32>
      %171 = arith.mulf %170, %170 : vector<1x32xf32>
      %cst_82 = arith.constant dense<0.000000e+00> : vector<1xf32>
      %172 = vector.multi_reduction <add>, %171, %cst_82 [1] : vector<1x32xf32> to vector<1xf32>
      %173 = vector.shape_cast %172 : vector<1xf32> to vector<1x1xf32>
      %cst_83 = arith.constant 3.200000e+01 : f32
      %174 = vector.broadcast %cst_83 : f32 to vector<1x1xf32>
      %175 = arith.divf %173, %174 : vector<1x1xf32>
      %176 = vector.broadcast %168 : vector<1x1xf32> to vector<1x32xf32>
      %177 = arith.subf %162, %176 : vector<1x32xf32>
      %cst_84 = arith.constant 9.99999974E-6 : f32
      %178 = vector.broadcast %cst_84 : f32 to vector<1x1xf32>
      %179 = arith.addf %175, %178 : vector<1x1xf32>
      %180 = math.rsqrt %179 : vector<1x1xf32>
      %181 = vector.broadcast %180 : vector<1x1xf32> to vector<1x32xf32>
      %182 = arith.mulf %177, %181 : vector<1x32xf32>
      %183 = arith.mulf %182, %163 : vector<1x32xf32>
      %184 = arith.addf %183, %164 : vector<1x32xf32>
      %c0_85 = arith.constant 0 : index
      %c0_86 = arith.constant 0 : index
      %c0_87 = arith.constant 0 : index
      %185 = vector.load %arg21[%c0_85, %c0_86, %c0_87] : memref<1x1x32xf32, #tpu.memory_space<vmem>>, vector<1x1x32xf32>
      %186 = vector.shape_cast %185 : vector<1x1x32xf32> to vector<1x32xf32>
      %187 = vector.shape_cast %184 : vector<1x32xf32> to vector<1x1x32xf32>
      tpu.vector_store %arg21[%c0_85, %c0_86, %c0_87], %187 {strides = array<i32>} : memref<1x1x32xf32, #tpu.memory_space<vmem>>, vector<1x1x32xf32>,
    } else {
    }
    return
  }
  func.func @transform_0(%arg0: i32, %arg1: i32) -> (i32, i32, i32) {
    %c0_i32 = arith.constant 0 : i32
    %c0_i32_0 = arith.constant 0 : i32
    %c0_i32_1 = arith.constant 0 : i32
    return %arg0, %c0_i32, %c0_i32_0 : i32, i32, i32
  }
  func.func @transform_1(%arg0: i32, %arg1: i32) -> (i32, i32) {
    %c0_i32 = arith.constant 0 : i32
    %c0_i32_0 = arith.constant 0 : i32
    %c0_i32_1 = arith.constant 0 : i32
    return %c0_i32, %c0_i32_0 : i32, i32
  }
  func.func @transform_2(%arg0: i32, %arg1: i32) -> (i32, i32) {
    %c0_i32 = arith.constant 0 : i32
    %c0_i32_0 = arith.constant 0 : i32
    %c0_i32_1 = arith.constant 0 : i32
    return %c0_i32, %c0_i32_0 : i32, i32
  }
  func.func @transform_3(%arg0: i32, %arg1: i32) -> (i32, i32) {
    %c0_i32 = arith.constant 0 : i32
    %c0_i32_0 = arith.constant 0 : i32
    %c0_i32_1 = arith.constant 0 : i32
    return %c0_i32, %c0_i32_0 : i32, i32
  }
  func.func @transform_4(%arg0: i32, %arg1: i32) -> (i32, i32) {
    %c0_i32 = arith.constant 0 : i32
    %c0_i32_0 = arith.constant 0 : i32
    %c0_i32_1 = arith.constant 0 : i32
    return %c0_i32, %c0_i32_0 : i32, i32
  }
  func.func @transform_5(%arg0: i32, %arg1: i32) -> (i32, i32, i32) {
    %c0_i32 = arith.constant 0 : i32
    %c0_i32_0 = arith.constant 0 : i32
    %c0_i32_1 = arith.constant 0 : i32
    return %arg1, %c0_i32, %c0_i32_0 : i32, i32, i32
  }
  func.func @transform_6(%arg0: i32, %arg1: i32) -> (i32, i32, i32) {
    %c0_i32 = arith.constant 0 : i32
    %c0_i32_0 = arith.constant 0 : i32
    %c0_i32_1 = arith.constant 0 : i32
    return %arg1, %c0_i32, %c0_i32_0 : i32, i32, i32
  }
  func.func @transform_7(%arg0: i32, %arg1: i32) -> (i32, i32, i32) {
    %c0_i32 = arith.constant 0 : i32
    %c0_i32_0 = arith.constant 0 : i32
    %c0_i32_1 = arith.constant 0 : i32
    return %arg1, %c0_i32, %c0_i32_0 : i32, i32, i32
  }
  func.func @transform_8(%arg0: i32, %arg1: i32) -> (i32, i32, i32) {
    %c0_i32 = arith.constant 0 : i32
    %c0_i32_0 = arith.constant 0 : i32
    %c0_i32_1 = arith.constant 0 : i32
    return %arg1, %c0_i32, %c0_i32_0 : i32, i32, i32
  }
  func.func @transform_9(%arg0: i32, %arg1: i32) -> (i32, i32, i32) {
    %c0_i32 = arith.constant 0 : i32
    %c0_i32_0 = arith.constant 0 : i32
    %c0_i32_1 = arith.constant 0 : i32
    return %arg1, %c0_i32, %c0_i32_0 : i32, i32, i32
  }
  func.func @transform_10(%arg0: i32, %arg1: i32) -> (i32, i32, i32) {
    %c0_i32 = arith.constant 0 : i32
    %c0_i32_0 = arith.constant 0 : i32
    %c0_i32_1 = arith.constant 0 : i32
    return %arg1, %c0_i32, %c0_i32_0 : i32, i32, i32
  }
  func.func @transform_11(%arg0: i32, %arg1: i32) -> (i32, i32, i32) {
    %c0_i32 = arith.constant 0 : i32
    %c0_i32_0 = arith.constant 0 : i32
    %c0_i32_1 = arith.constant 0 : i32
    return %arg1, %c0_i32, %c0_i32_0 : i32, i32, i32
  }
  func.func @transform_12(%arg0: i32, %arg1: i32) -> (i32, i32, i32) {
    %c0_i32 = arith.constant 0 : i32
    %c0_i32_0 = arith.constant 0 : i32
    %c0_i32_1 = arith.constant 0 : i32
    return %arg1, %c0_i32, %c0_i32_0 : i32, i32, i32
  }
  func.func @transform_13(%arg0: i32, %arg1: i32) -> (i32, i32, i32) {
    %c0_i32 = arith.constant 0 : i32
    %c0_i32_0 = arith.constant 0 : i32
    %c0_i32_1 = arith.constant 0 : i32
    return %arg1, %c0_i32, %c0_i32_0 : i32, i32, i32
  }
  func.func @transform_14(%arg0: i32, %arg1: i32) -> (i32, i32, i32) {
    %c0_i32 = arith.constant 0 : i32
    %c0_i32_0 = arith.constant 0 : i32
    %c0_i32_1 = arith.constant 0 : i32
    return %arg1, %c0_i32, %c0_i32_0 : i32, i32, i32
  }
  func.func @transform_15(%arg0: i32, %arg1: i32) -> (i32, i32, i32) {
    %c0_i32 = arith.constant 0 : i32
    %c0_i32_0 = arith.constant 0 : i32
    %c0_i32_1 = arith.constant 0 : i32
    return %arg1, %c0_i32, %c0_i32_0 : i32, i32, i32
  }
  func.func @transform_16(%arg0: i32, %arg1: i32) -> (i32, i32, i32) {
    %c0_i32 = arith.constant 0 : i32
    %c0_i32_0 = arith.constant 0 : i32
    %c0_i32_1 = arith.constant 0 : i32
    return %arg1, %c0_i32, %c0_i32_0 : i32, i32, i32
  }
  func.func @transform_17(%arg0: i32, %arg1: i32) -> (i32, i32) {
    %c0_i32 = arith.constant 0 : i32
    %c0_i32_0 = arith.constant 0 : i32
    %c0_i32_1 = arith.constant 0 : i32
    return %c0_i32, %c0_i32_0 : i32, i32
  }
  func.func @transform_18(%arg0: i32, %arg1: i32) -> (i32, i32) {
    %c0_i32 = arith.constant 0 : i32
    %c0_i32_0 = arith.constant 0 : i32
    %c0_i32_1 = arith.constant 0 : i32
    return %c0_i32, %c0_i32_0 : i32, i32
  }
  func.func @transform_19(%arg0: i32, %arg1: i32) -> (i32, i32, i32) {
    %c0_i32 = arith.constant 0 : i32
    %c0_i32_0 = arith.constant 0 : i32
    %c0_i32_1 = arith.constant 0 : i32
    return %arg0, %c0_i32, %c0_i32_0 : i32, i32, i32
  }
}

</mosaic_0001>

<bundles_post_ra>
// kernel: embedding_model_forward.1
= control target key start
LH: loop header
LB: loop body
LE: loop exit
PB: predicated region body
PF: predicated region fallthrough
CT: control target
= control target key end

     0   :  { %s2657_s0 = inlined_call_operand.vmem [shape: bf16[2,8,16], index: 0, kind: input, shape index: {}]   ;;  %s2658_s1 = inlined_call_operand.vmem [shape: f32[8,32], index: 1, kind: input, shape index: {}]   ;;  %s2659_s2 = inlined_call_operand.vmem [shape: bf16[16,32], index: 2, kind: input, shape index: {}]   ;;  %s2660_s3 = inlined_call_operand.vmem [shape: f32[1,32], index: 3, kind: input, shape index: {}]   ;;  %s2661_s4 = inlined_call_operand.vmem [shape: bf16[32,32], index: 4, kind: input, shape index: {}]   ;;  %s2662_s5 = inlined_call_operand.vmem [shape: f32[2,1,32], index: 5, kind: input, shape index: {}]   ;;  %s2663_s6 = inlined_call_operand.vmem [shape: f32[2,1,32], index: 6, kind: input, shape index: {}]   ;;  %s2664_s7 = inlined_call_operand.vmem [shape: bf16[2,32,96], index: 7, kind: input, shape index: {}]   ;;  %s2665_s8 = inlined_call_operand.vmem [shape: f32[2,1,96], index: 8, kind: input, shape index: {}]   ;;  %s2666_s9 = inlined_call_operand.vmem [shape: bf16[2,32,32], index: 9, kind: input, shape index: {}]   ;;  %s2667_s10 = inlined_call_operand.vmem [shape: f32[2,1,32], index: 10, kind: input, shape index: {}]   ;;  %s2668_s11 = inlined_call_operand.vmem [shape: f32[2,1,32], index: 11, kind: input, shape index: {}]   ;;  %s2669_s12 = inlined_call_operand.vmem [shape: f32[2,1,32], index: 12, kind: input, shape index: {}]   ;;  %s2670_s13 = inlined_call_operand.vmem [shape: bf16[2,32,64], index: 13, kind: input, shape index: {}]   ;;  %s2671_s14 = inlined_call_operand.vmem [shape: f32[2,1,64], index: 14, kind: input, shape index: {}]   ;;  %s2672_s15 = inlined_call_operand.vmem [shape: bf16[2,64,32], index: 15, kind: input, shape index: {}]   ;;  %s2673_s16 = inlined_call_operand.hbm [shape: f32[2,1,32], index: 16, kind: input, shape index: {}]   ;;  %s2674_s17 = inlined_call_operand.vmem [shape: f32[1,32], index: 17, kind: input, shape index: {}]   ;;  %s2675_s18 = inlined_call_operand.vmem [shape: f32[1,32], index: 18, kind: input, shape index: {}]   ;;  %s2676_s19 = inlined_call_operand.hbm [shape: f32[2,1,32], index: 19, kind: output, shape index: {}]  }
   0x1   :  { %2693 = sst [smem:[#allocation24_spill]] %s2657_s0 }
   0x2   :  { %2694 = sst [smem:[#allocation25_spill]] %s2658_s1 }
   0x3   :  { %2695 = sst [smem:[#allocation26_spill]] %s2659_s2 }
   0x4   :  { %2696 = sst [smem:[#allocation27_spill]] %s2660_s3 }
   0x5   :  { %2697 = sst [smem:[#allocation28_spill]] %s2661_s4 }
   0x6   :  { %2698 = sst [smem:[#allocation29_spill]] %s2664_s7 }
   0x7   :  { %2699 = sst [smem:[#allocation30_spill]] %s2666_s9 }
   0x8   :  { %2700 = sst [smem:[#allocation31_spill]] %s2667_s10 }
   0x9   :  { %2701 = sst [smem:[#allocation32_spill]] %s2670_s13 }
   0xa   :  { %2702 = sst [smem:[#allocation33_spill]] %s2671_s14 }
   0xb   :  { %2703 = sst [smem:[#allocation34_spill]] %s2672_s15 }
   0xc   :  { %2704 = sst [smem:[#allocation35_spill]] %s2673_s16 }
   0xd   :  { %2705 = sst [smem:[#allocation36_spill]] %s2674_s17 }
   0xe   :  { %2706 = sst [smem:[#allocation37_spill]] %s2675_s18 }
   0xf   :  { %2707 = sst [smem:[#allocation38_spill]] %s2676_s19 }
  0x10   :  { %24 = vsyncpa [#allocation4], 0 }
  0x11   :  { %26 = vsyncpa [#allocation4 + $0x1], 0 }
  0x12   :  { %27 = vsyncpa [#allocation5], 0 }
  0x13   :  { %29 = vsyncpa [#allocation5 + $0x1], 0  ;;  %s2264_s0 = smov 0   ;;  %s2266_s30 = smov 0  }
  0x14   :  { %s2268_s20 = smov 0   ;;  %s2270_s21 = smov 0  }
  0x15   :  { %s2272_s1 = smov 0   ;;  %s2274_s22 = smov 0  }
  0x16   :  { %s2276_s2 = smov 0   ;;  %s2278_s23 = smov 0  }
  0x17   :  { %s2280_s24 = smov 0   ;;  %s2282_s25 = smov 0  }
  0x18   :  { %s2284_s3 = smov 0  }
  0x19 LB: > { %2708 = sst [smem:[#allocation9_spill]] %s2114_s0  ;;  %s1722_s26 = sadd.s32 4294967295, %s2154_s3   ;;  %s2154_s3 = sphi %s2284_s3, %s35_s3   ;;  %s2150_s25 = sphi %s2282_s25, %s2766_s25   ;;  %s2146_s24 = sphi %s2280_s24, %s2765_s24   ;;  %s2142_s23 = sphi %s2278_s23, %s2764_s23   ;;  %s2138_s2 = sphi %s2276_s2, %s2763_s2   ;;  %s2134_s22 = sphi %s2274_s22, %s2762_s22   ;;  %s2130_s1 = sphi %s2272_s1, %s2761_s1   ;;  %s2126_s21 = sphi %s2270_s21, %s2760_s21   ;;  %s2122_s20 = sphi %s2268_s20, %s2759_s20   ;;  %s2118_s30 = sphi %s2266_s30, %s2768_s30   ;;  %s2114_s0 = sphi %s2264_s0, %s2767_s0  }
  0x1a   : > { %2709 = sst [smem:[#allocation10_spill]] %s2122_s20  ;;  %s1723_s27 = sadd.s32 4294967294, %s2154_s3  }
  0x1b   : > { %2710 = sst [smem:[#allocation11_spill]] %s2130_s1  ;;  %s44_s28 = sadd.s32 1, %s2146_s24 }
  0x1c   : > { %2711 = sst [smem:[#allocation12_spill]] %s2134_s22  ;;  %s47_s29 = sadd.s32 1, %s2150_s25 }
  0x1d   : > { %2712 = sst [smem:[#allocation13_spill]] %s2142_s23  ;;  %p45_p0 = scmp.ge.s32.totalorder %s44_s28, 2 }
  0x1e   : > { %2713 = sst [smem:[#allocation14_spill]] %s2146_s24  ;;  %s450_s19 = sadd.s32 1, %s2134_s22 }
  0x1f   : > { %2714 = sst [smem:[#allocation15_spill]] %s2150_s25  ;;  %p457_p1 = scmp.ne.s32.totalorder %s2134_s22, %s2130_s1 }
  0x20   : > { %2715 = sst [smem:[#allocation16_spill]] %s2154_s3  ;;  %p458_p2 = scmp.eq.s32.totalorder %s2154_s3, 0 }
  0x21   : > { %s2770_s28 = smov (%p45_p0, %s44_s28), 0  ;;  %s2772_s29 = smov (!%p45_p0, %s47_s29), %s2150_s25 }
  0x22   : > { %2716 = sst [smem:[#allocation17_spill]] %s2770_s28  ;;  %s447_s18 = ssub.s32 %s2146_s24, %s2770_s28 }
  0x23   : > { %p2330_p3 = por %p458_p2, %p457_p1  ;;  %p49_p4 = scmp.ge.s32.totalorder %s2772_s29, 2 }
  0x24   : > { %p448_p5 = scmp.eq.s32.totalorder %s447_s18, 0  ;;  %p463_p6 = scmp.ne.s32.totalorder %s2130_s1, %s2126_s21 }
  0x25   : > { %p464_p7 = scmp.eq.s32.totalorder %s1722_s26, 0  ;;  %s2774_s29 = smov (%p49_p4, %s2772_s29), 0 }
  0x26   : > { %2718 = sst [smem:[#allocation18_spill]] %s2774_s29  ;;  %s515_s15 = ssub.s32 %s2150_s25, %s2774_s29 }
  0x27   : > { %s2338_s4 = scalar_select %p448_p5, %s2134_s22, %s450_s19  }
  0x28   : > { %p2340_p8 = por %p464_p7, %p463_p6  ;;  %p516_p9 = scmp.eq.s32.totalorder %s515_s15, 0 }
  0x29   : > { %2719 = sst [smem:[#allocation19_spill]] %s2338_s4  ;;  %s518_s14 = sadd.s32 1, %s2122_s20 }
  0x2a   : > { %p528_p10 = scmp.ne.s32.totalorder %s2122_s20, %s2118_s30  ;;  %p529_p11 = scmp.eq.s32.totalorder %s1722_s26, 3 }
  0x2b   : > { %s2350_s18 = scalar_select %p516_p9, %s2122_s20, %s518_s14  }
  0x2c   : > { %p2352_p12 = por %p529_p11, %p528_p10  ;;  %p534_p13 = scmp.ne.s32.totalorder %s2118_s30, %s2114_s0 }
  0x2d   : > { %2721 = sst [smem:[#allocation20_spill]] %s2350_s18  ;;  %p535_p0 = scmp.eq.s32.totalorder %s1723_s27, 3 }
  0x2e   : > { %s2722_s21 = scalar_select %p2352_p12, 1, 0 }
  0x2f   : > { %p1871_p1 = scmp.lt.s32.totalorder %s2154_s3, 4  ;;  %s654_s19 = sand.u32 1, %s2134_s22  }
  0x30   : > { %2723 = sst [smem:[#allocation21_spill]] %s2722_s21  ;;  %p2360_p2 = por %p535_p0, %p534_p13 }
  0x31   : > { %s1726_s15 = sshll.u32 %s2146_s24, 4  ;;  %s2726_s16 = sld [smem:[#allocation35_spill]] }
  0x32   : > { %s2724_s4 = scalar_select %p2360_p2, 1, 0 }
  0x33   : > { %s657_s26 = scalar_lea.vmem [#allocation3], %s654_s19  ;;  %p2370_p4 = pnand %p1871_p1, %p2330_p3 }
  0x34   : > { %2725 = sst [smem:[#allocation22_spill]] %s2724_s4  ;;  %s664_s14 = sshll.u32 %s657_s26, 4  ;;  %s665_s14 = int_to_ptr.vmem [resolvable:$true] %s664_s14 }
  0x35   : > { %p1727_p5 = scmp.ge.s32.totalorder %s2154_s3, 1  ;;  %p669_p6 = scmp.lt.s32.totalorder %s2154_s3, 5 }
  0x36   : > { %s655_s27 = scalar_lea.sflag [#allocation4], %s654_s19  ;;  %p2008_p7 = pneg %p2370_p4 }
  0x37   : > { %s662_s13 = scalar_lea.hbm %s2726_s16, %s1726_s15  ;;  %s2019_s22 = scalar_lea.vmem %s665_s14, 16 }
  0x38   : > { %p2020_p9 = scmp.ne.s32.totalorder %s665_s14, %s2019_s22  ;;  %s2156_s25 = smov [#allocation3]  }
  0x39   : > { %s2024_s29 = sshll.u32 %s2156_s25, 4  ;;  %s2025_s29 = int_to_ptr.vmem [resolvable:$false] %s2024_s29 }
  0x3a   : > { %p2022_p10 = pnand %p2020_p9, %p2008_p7  ;;  %s2026_s15 = scalar_lea.vmem %s2025_s29, 32 }
  0x3b   : > { %p2027_p13 = scmp.lt.s32.totalorder %s665_s14, %s2025_s29  ;;  %p2028_p0 = scmp.lt.s32.totalorder %s2026_s15, %s2019_s22 }
  0x3c   : > { %p2023_p11 = pneg %p2022_p10 }
  0x3d   : > { %p2029_p3 = por %p2028_p0, %p2027_p13 }
  0x3f   : > { %p2030_p1 = pnand %p2029_p3, %p2023_p11 }
  0x41   : > { %2033 = shalt.err (!%p2030_p1)
}
  0x42   : > { %1866 = dma.hbm_to_vmem [thread:$0]  (!%p2370_p4), %s662_s13, 16, %s665_s14, %s655_s27  }
  0x43   : > { %p670_p2 = pnand %p1727_p5, %p669_p6 }
  0x45   : > { %673 = sbr.rel (%p670_p2) target bundleno = 2966 (0xb96), region = 96 }
  0x4a   : > { %s675_s17 = sand.u32 1, %s2130_s1  }
  0x4b   : > { %s676_s19 = scalar_lea.sflag [#allocation4], %s675_s17  ;;  %s2385_s26 = scalar_lea.vmem [#allocation3], %s675_s17 }
  0x4c   : > { %2728 = sst [smem:[#allocation23_spill]] %s2385_s26 }
  0x4d   : > { %2105 = dma.done.wait (%p2340_p8), %s676_s19, 16  }
  0x4e   : > { %2107 = vsyncadd (%p2340_p8), %s676_s19, 4294967280  ;;  %p776_p4 = scmp.lt.s32.totalorder %s2142_s23, 1  ;;  %p780_p5 = scmp.lt.s32.totalorder %s2138_s2, 1 }
  0x4f   : > { %s2729_s25 = sld [smem:[#allocation24_spill]]  ;;  %s2736_s13 = sand.u32 1, %s2118_s30  }
  0x50   : > { %s777_s22 = scalar_select %p776_p4, %s2142_s23, 1 }
  0x51   : > { %s2396_s18 = scalar_select %p780_p5, %s2138_s2, 1 }
  0x52   : > { %s1728_s28 = sshll.u32 %s777_s22, 2  ;;  %s2730_s7 = sld [smem:[#allocation29_spill]] }
  0x53   : > { %s1776_s1 = sshll.u32 %s2396_s18, 4  ;;  %s2731_s9 = sld [smem:[#allocation30_spill]] }
  0x54   : > { %s804_s24 = scalar_lea.vmem %s2668_s11, %s2396_s18  ;;  %s807_s19 = scalar_lea.vmem %s2669_s12, %s2396_s18 }
  0x55   : > { %s779_s29 = scalar_lea.vmem %s2729_s25, %s1728_s28  ;;  %s2733_s22 = sld [smem:[#allocation32_spill]] }
  0x56   : > { %s1779_s26 = sshll.u32 %s2396_s18, 5  ;;  %s2735_s16 = sld [smem:[#allocation34_spill]] }
  0x57   : > { %s2453_s17 = scalar_lea.vmem [#allocation6], %s2736_s13  ;;  %p1737_p8 = scmp.ne.s32.totalorder %s2138_s2, 0 }
  0x58   : > { %s2413_s0 = scalar_lea.vmem %s2730_s7, %s1776_s1 }
  0x59   : > { %s2422_s27 = scalar_lea.vmem %s2731_s9, %s1776_s1  ;;  %s2734_s9 = sld [smem:[#allocation33_spill]] }
  0x5b   : > { %s2439_s21 = scalar_lea.vmem %s2733_s22, %s1776_s1  ;;  %825 = sbr.rel (%p1737_p8) target bundleno = 301 (0x12d), region = 104 }
  0x5c   : > { %s2449_s10 = scalar_lea.vmem %s2735_s16, %s1779_s26  ;;  %s2737_s1 = sld [smem:[#allocation26_spill]] (!%p1737_p8) }
  0x5d   : > { %s2738_s16 = sld [smem:[#allocation27_spill]] (!%p1737_p8) }
  0x5e   : > { %s2739_s22 = sld [smem:[#allocation25_spill]] (!%p1737_p8) }
  0x5f   : > { %s815_s23 = scalar_lea.vmem %s2734_s9, %s2396_s18 }
  0x60   : > { %v2157_v1 = vmov 0.0   ;;  %vm2158_vm0 = vmmov 0   ;;  %v826_v2 = vld [vmem:[%s779_s29] sm:$0xf]  ;;  %vm842_vm1 = vcmask 130048   ;;  %vm888_vm2 = vcmask 261120  }
  0x61   : > { %1803 = vmatprep.subr.bf16.mxu0 %v2157_v1  ;;  %1805 = vmatprep.mubr.msk.bf16.mxu0 %vm2158_vm0, %v2157_v1 }
  0x62   : > { %v1967_v0 = vld [vmem:[%s2737_s1] sm:$0xff]  }
  0x63   : > { %1804 = vmatpush3.bf16.msra.mxu0 %v1967_v0  ;;  %v1738_v3 = vld [vmem:[%s2738_s16] ss:$0 sm:$0xff] }
  0x64   : > { %v886_v5 = vld [vmem:[%s2739_s22] sm:$0xff] }
  0x66   : > { %1806 = vmatmul.mubr.msk.bf16.vlgmr.msra.gmra.mxu0 %vm842_vm1, %v826_v2 }
 0x126   : > { %v880_v4 = vpop.f32.mrf.mxu0 }
 0x127   : > { %v881_v6 = vadd.f32 %v1738_v3, %v880_v4 }
 0x128   : > { %v1807_v7 = vpop.f32.mrf.mxu0 }
 0x129   : > { %v887_v8 = vadd.f32 %v886_v5, %v881_v6 }
 0x12a   : > { %v883_v9 = vpop.f32.mrf.mxu0 }
 0x12b   : > { %889 = vst.msk [vmem:[#allocation2] sm:$0xff] %vm888_vm2, %v887_v8 }
 0x12c   : > { %v1808_v10 = vpop.f32.mrf.mxu0 }
 0x12d PF: > { %vm893_vm3 = vcmask 261120   ;;  %v1968_v18 = vld [vmem:[%s2413_s0 + $0x8] sm:$0xff]   ;;  %v2159_v19 = vmov 0.0   ;;  %vm2160_vm4 = vmmov 0   ;;  %v1969_v20 = vld [vmem:[%s2413_s0] sm:$0xff]   ;;  %s2740_s28 = scalar_lea.vmem %s2662_s5, %s2396_s18  ;;  %s2741_s13 = scalar_lea.vmem %s2663_s6, %s2396_s18  ;;  %vm1069_vm5 = vcmask 64512  }
 0x12e   : > { %1809 = vmatprep.subr.bf16.mxu0 %v2159_v19  ;;  %1813 = vmatprep.mubr.msk.bf16.mxu0 %vm2160_vm4, %v2159_v19  ;;  %v1741_v25 = vld [vmem:[%s2740_s28] ss:$0 sm:$0xff]  ;;  %s2742_s7 = scalar_lea.vmem %s2665_s8, %s2396_s18  ;;  %s2743_s26 = sld [smem:[#allocation28_spill]]  ;;  %vm1124_vm6 = vcmask 1043456   ;;  %vm1443_vm8 = vcmask 523264  }
 0x12f   : > { %1810 = vmatpush3.bf16.msra.mxu0 %v1968_v18  ;;  %v1742_v27 = vld [vmem:[%s2741_s13] ss:$0 sm:$0xff]  ;;  %s2161_s3 = smov 96   ;;  %s2162_s25 = smov 64  }
 0x130   : > { %1811 = vmatprep.subr.bf16.mxu0 %v2159_v19  ;;  %v1743_v31 = vld [vmem:[%s2742_s7] ss:$0 sm:$0xff]  ;;  %s2744_s13 = sld [smem:[#allocation31_spill]]  ;;  %p1772_p2 = scmp.ne.s32.totalorder %s2138_s2, 1 }
 0x132   : > { %v2465_v11 = vld [vmem:[#allocation2] sm:$0xff] }
 0x133   : > { %v894_v12 = vsel %vm893_vm3, %v2465_v11, 0.0  ;;  %1812 = vmatpush3.bf16.msra.mxu0 %v1969_v20 }
 0x134   : > { %895 = vadd.xlane.f32.xlu0 %v894_v12  ;;  %v2496_v35 = vld [vmem:[%s2743_s26] sm:$0xf]  ;;  %v2501_v36 = vld [vmem:[%s2743_s26 + $0x4] sm:$0xf]  ;;  %v2509_v44 = vld [vmem:[%s2743_s26 + $0x8] sm:$0xf] }
 0x135   : > { %v2514_v45 = vld [vmem:[%s2743_s26 + $0xc] sm:$0xf] }
 0x136   : > { %s2745_s0 = scalar_lea.vmem %s2744_s13, %s2396_s18  ;;  %s2748_s18 = sld [smem:[#allocation36_spill]] (!%p1772_p2) }
 0x1bd   : > { %v896_v13 = vpop.xlane.xlu0 %895 }
 0x1be   : > { %v898_v14 = vmul.f32 0.03125, %v896_v13 }
 0x1c0   : > { %v899_v15 = vsub.f32 %v2465_v11, %v898_v14 }
 0x1c2   : > { %v900_v16 = vmul.f32 %v899_v15, %v899_v15 }
 0x1c4   : > { %v901_v17 = vsel %vm893_vm3, %v900_v16, 0.0 }
 0x1c5   : > { %902 = vadd.xlane.f32.xlu0 %v901_v17 }
 0x24e   : > { %v903_v21 = vpop.xlane.xlu0 %902 }
 0x24f   : > { %v904_v22 = vmul.f32 0.03125, %v903_v21 }
 0x251   : > { %v905_v23 = vadd.f32 1e-05, %v904_v22 }
 0x253   : > { %1980 = vrsqrt.f32 %v905_v23 }
 0x260   : > { %v1981_v24 = vpop.eup %1980 }
 0x261   : > { %v907_v26 = vmul.f32 %v1981_v24, %v899_v15 }
 0x263   : > { %v914_v28 = vmul.f32 %v1741_v25, %v907_v26 }
 0x265   : > { %v921_v29 = vadd.f32 %v1742_v27, %v914_v28 }
 0x267   : > { %v922_v30 = vpack.c.bf16 %v921_v29, %v921_v29 }
 0x269   : > { %1814 = vmatmul.mubr.msk.bf16.vlgmr.msra.gmra.mxu0 %vm893_vm3, %v922_v30 }
 0x329   : > { %v983_v32 = vpop.f32.mrf.mxu0 }
 0x32a   : > { %v984_v33 = vadd.f32 %v1743_v31, %v983_v32  ;;  %v1970_v32 = vld [vmem:[%s2422_s27 + $0x8] sm:$0xff]  }
 0x32b   : > { %v1815_v34 = vpop.f32.mrf.mxu0 }
 0x32c   : > { %v989_v37 = vpack.c.bf16 %v984_v33, %v984_v33  ;;  %v1973_v33 = vld [vmem:[%s2422_s27] sm:$0xff]  }
 0x32d   : > { %v986_v38 = vpop.f32.mrf.mxu0 }
 0x32e   : > { %1009 = vrot.lane.b32.xlu1 %v989_v37, %s2161_s3  ;;  %v994_v39 = vmul.bf16 %v2496_v35, %v989_v37  ;;  %v995_v40 = vmul.bf16 %v2501_v36, %v989_v37  ;;  %v996_v47 = vmul.bf16 %v2509_v44, %v989_v37  ;;  %v997_v48 = vmul.bf16 %v2514_v45, %v989_v37  ;;  %s2749_s3 = sld [smem:[#allocation37_spill]] (!%p1772_p2) }
 0x32f   : > { %v1816_v41 = vpop.f32.mrf.mxu0 }
 0x330   : > { %v1747_v42 = vcombine.low %v994_v39, %v995_v40  ;;  %v1748_v49 = vcombine.low %v996_v47, %v997_v48  ;;  %v1753_v39 = vcombine.low %v2496_v35, %v2501_v36  ;;  %v1754_v41 = vcombine.low %v2509_v44, %v2514_v45 }
 0x332   : > { %1819 = vmatprep.mubr.msk.bf16.mxu1 %vm893_vm3, %v1747_v42 }
 0x3a0   : > { %v1010_v43 = vpop.permute.xlu1 %1009 }
 0x3a1   : > { %1857 = vmatprep.subr.msk.bf16.mxu1 %vm893_vm3, %v1010_v43  ;;  %v1018_v46 = vsel %vm893_vm3, %v1010_v43, 0 }
 0x3a2   : > { %1818 = vmatpush3.bf16.xpose.msra.mxu1 %v1018_v46 }
 0x3a3   : > { %1829 = vmatprep.subr.bf16.mxu1 %v1970_v32 }
 0x3a9   : > { %1820 = vmatmul.mubr.msk.bf16.vlgmr.msra.gmra.mxu1 %vm893_vm3, %v1748_v49 }
 0x3aa   : > { %1830 = vmatpush3.bf16.msra.mxu1 %v1970_v32 }
 0x3ab   : > { %1831 = vmatprep.subr.bf16.mxu1 %v1973_v33 }
 0x3ae   : > { %1832 = vmatpush3.bf16.msra.mxu1 %v1973_v33 }
 0x3af   : > { %1845 = vmatprep.subr.bf16.mxu1 %v2159_v19 }
 0x469   : > { %v1821_v50 = vpop.f32.mrf.mxu1 }
 0x46a   : > { %v1076_v51 = vsel %vm1069_vm5, %v1821_v50, -inf }
 0x46b   : > { %1077 = vmax.xlane.f32.xlu0 %v1076_v51  ;;  %v1054_v52 = vpop.f32.mrf.mxu1 }
 0x46c   : > { %v1070_v53 = vsel %vm1069_vm5, %v1054_v52, -inf }
 0x46d   : > { %1071 = vmax.xlane.f32.xlu1 %v1070_v53  ;;  %v1822_v54 = vpop.f32.mrf.mxu1 }
 0x46e   : > { %v1079_v57 = vsel %vm1069_vm5, %v1822_v54, -inf }
 0x46f   : > { %v1057_v55 = vpop.f32.mrf.mxu1 }
 0x470   : > { %v1073_v56 = vsel %vm1069_vm5, %v1057_v55, -inf }
 0x471   : > { %1074 = vmax.xlane.f32.xlu0 %v1073_v56 }
 0x475   : > { %1080 = vmax.xlane.f32.xlu0 %v1079_v57 }
 0x4f4   : > { %v1078_v58 = vpop.xlane.xlu0 %1077 }
 0x4f5   : > { %v1084_v59 = vsub.f32 %v1821_v50, %v1078_v58 }
 0x4f6   : > { %v1072_v60 = vpop.xlane.xlu1 %1071 }
 0x4f7   : > { %v1090_v61 = vmul.f32 1.442695, %v1084_v59  ;;  %v1082_v62 = vsub.f32 %v1054_v52, %v1072_v60 }
 0x4f9   : > { %1982 = vpow2.f32 %v1090_v61  ;;  %v1086_v63 = vmul.f32 1.442695, %v1082_v62 }
 0x4fa   : > { %v1075_v0 = vpop.xlane.xlu0 %1074 }
 0x4fb   : > { %1984 = vpow2.f32 %v1086_v63  ;;  %v1083_v1 = vsub.f32 %v1057_v55, %v1075_v0  ;;  %v1759_v55 = vld [vmem:[%s2745_s0] ss:$0 sm:$0xff]  ;;  %v1974_v0 = vld [vmem:[%s2439_s21 + $0x8] sm:$0xff]  }
 0x4fd   : > { %v1088_v4 = vmul.f32 1.442695, %v1083_v1 }
 0x4fe   : > { %v1081_v2 = vpop.xlane.xlu0 %1080 }
 0x4ff   : > { %v1085_v3 = vsub.f32 %v1822_v54, %v1081_v2 }
 0x501   : > { %v1092_v5 = vmul.f32 1.442695, %v1085_v3 }
 0x503   : > { %1986 = vpow2.f32 %v1092_v5  ;;  %v1760_v5 = vld [vmem:[%s804_s24] ss:$0 sm:$0xff] }
 0x504   : > { %1988 = vpow2.f32 %v1088_v4 }
 0x506   : > { %v1983_v6 = vpop.eup %1982 }
 0x507   : > { %v1100_v7 = vsel %vm1069_vm5, %v1983_v6, 0.0 }
 0x508   : > { %v1985_v8 = vpop.eup %1984  ;;  %1101 = vadd.xlane.f32.xlu0 %v1100_v7  ;;  %v1761_v7 = vld [vmem:[%s807_s19] ss:$0 sm:$0xff] }
 0x509   : > { %v1094_v9 = vsel %vm1069_vm5, %v1985_v8, 0.0 }
 0x50c   : > { %1095 = vadd.xlane.f32.xlu0 %v1094_v9 }
 0x510   : > { %v1987_v10 = vpop.eup %1986 }
 0x511   : > { %v1103_v12 = vsel %vm1069_vm5, %v1987_v10, 0.0  ;;  %v1989_v13 = vpop.eup %1988 }
 0x512   : > { %1104 = vadd.xlane.f32.xlu0 %v1103_v12  ;;  %v1097_v14 = vsel %vm1069_vm5, %v1989_v13, 0.0  ;;  %v1976_v12 = vld [vmem:[%s2449_s10 + $0x18] sm:$0xff]  }
 0x516   : > { %1098 = vadd.xlane.f32.xlu0 %v1097_v14  ;;  %v1978_v14 = vld [vmem:[%s2449_s10 + $0x8] sm:$0xff]  }
 0x52c   : > { %1116 = vrot.lane.b32.xlu0 %v989_v37, %s2162_s25 }
 0x591   : > { %v1102_v15 = vpop.xlane.xlu0 %1101 }
 0x595   : > { %v1096_v16 = vpop.xlane.xlu0 %1095 }
 0x59b   : > { %v1105_v17 = vpop.xlane.xlu0 %1104 }
 0x59c   : > { %1990 = vrcp.f32 %v1105_v17 }
 0x59d   : > { %1992 = vrcp.f32 %v1096_v16  ;;  %v1762_v16 = vld [vmem:[%s815_s23] ss:$0 sm:$0xff] }
 0x59e   : > { %1994 = vrcp.f32 %v1102_v15  ;;  %v1979_v15 = vld [vmem:[%s2449_s10] sm:$0xff]  }
 0x59f   : > { %v1099_v18 = vpop.xlane.xlu0 %1098 }
 0x5a0   : > { %1996 = vrcp.f32 %v1099_v18 }
 0x5a3   : > { %v1117_v20 = vpop.permute.xlu0 %1116 }
 0x5a4   : > { %v1126_v21 = vsel %vm1124_vm6, %v1117_v20, 0  ;;  %1858 = vmatprep.subr.msk.bf16.mxu0 %vm1124_vm6, %v1117_v20 }
 0x5a5   : > { %1824 = vmatpush3.bf16.msra.mxu0 %v1126_v21 }
 0x5a6   : > { %1837 = vmatprep.subr.bf16.mxu0 %v2159_v19 }
 0x5a9   : > { %v1991_v22 = vpop.eup %1990 }
 0x5aa   : > { %v1993_v23 = vpop.eup %1992  ;;  %v1113_v26 = vmul.f32 %v1991_v22, %v1987_v10 }
 0x5ab   : > { %v1995_v24 = vpop.eup %1994  ;;  %v1110_v27 = vmul.f32 %v1993_v23, %v1985_v8 }
 0x5ac   : > { %v1112_v29 = vmul.f32 %v1995_v24, %v1983_v6 }
 0x5ad   : > { %v1997_v25 = vpop.eup %1996 }
 0x5ae   : > { %v1111_v28 = vmul.f32 %v1997_v25, %v1989_v13  ;;  %v1115_v31 = vpack.c.bf16 %v1113_v26, %v1112_v29  ;;  %v1977_v13 = vld [vmem:[%s2449_s10 + $0x10] sm:$0xff]   ;;  %s2747_s10 = sld [smem:[#allocation23_spill]] }
 0x5b0   : > { %v1114_v30 = vpack.c.bf16 %v1111_v28, %v1110_v27 }
 0x5b2   : > { %1825 = vmatprep.mubr.msk.bf16.mxu0 %vm1069_vm5, %v1114_v30 }
 0x5b3   : > { %1826 = vmatmul.mubr.msk.bf16.vlgmr.msra.gmra.mxu0 %vm1069_vm5, %v1115_v31 }
 0x5b4   : > { %1841 = vmatprep.mubr.msk.bf16.mxu0 %vm2160_vm4, %v2159_v19  ;;  %1838 = vmatpush3.bf16.msra.mxu0 %v1974_v0 }
 0x5b5   : > { %1839 = vmatprep.subr.bf16.mxu0 %v2159_v19 }
 0x673   : > { %v1827_v34 = vpop.f32.mrf.mxu0 }
 0x675   : > { %v1162_v37 = vpop.f32.mrf.mxu0 }
 0x677   : > { %v1828_v38 = vpop.f32.mrf.mxu0 }
 0x678   : > { %v1178_v40 = vpack.c.bf16 %v1828_v38, %v1827_v34 }
 0x679   : > { %v1165_v42 = vpop.f32.mrf.mxu0 }
 0x67a   : > { %v1177_v43 = vpack.c.bf16 %v1165_v42, %v1162_v37  ;;  %v1192_v47 = vmul.bf16 %v1754_v41, %v1178_v40 }
 0x67c   : > { %v1191_v46 = vmul.bf16 %v1753_v39, %v1177_v43 }
 0x67e   : > { %1833 = vmatprep.mubr.msk.bf16.mxu1 %vm893_vm3, %v1191_v46 }
 0x67f   : > { %1834 = vmatmul.mubr.msk.bf16.vlgmr.msra.gmra.mxu1 %vm893_vm3, %v1192_v47 }
 0x680   : > { %1853 = vmatprep.mubr.msk.bf16.mxu1 %vm2160_vm4, %v2159_v19  ;;  %1846 = vmatpush3.bf16.msra.mxu1 %v1976_v12 }
 0x681   : > { %1847 = vmatprep.subr.bf16.mxu1 %v2159_v19 }
 0x684   : > { %1848 = vmatpush3.bf16.msra.mxu1 %v1977_v13 }
 0x685   : > { %1849 = vmatprep.subr.bf16.mxu1 %v2159_v19 }
 0x688   : > { %1850 = vmatpush3.bf16.msra.mxu1 %v1978_v14 }
 0x689   : > { %1851 = vmatprep.subr.bf16.mxu1 %v2159_v19 }
 0x68c   : > { %1852 = vmatpush3.bf16.msra.mxu1 %v1979_v15 }
 0x73f   : > { %v1835_v48 = vpop.f32.mrf.mxu1 }
 0x740   : > { %v1267_v51 = vsel %vm893_vm3, %v1835_v48, 0.0 }
 0x741   : > { %v1249_v49 = vpop.f32.mrf.mxu1 }
 0x742   : > { %v1264_v36 = vsel %vm893_vm3, %v1249_v49, 0.0 }
 0x743   : > { %v1836_v50 = vpop.f32.mrf.mxu1 }
 0x744   : > { %v1269_v53 = vsel %vm893_vm3, %v1836_v50, 0.0 }
 0x745   : > { %v1252_v35 = vpop.f32.mrf.mxu1 }
 0x746   : > { %v1265_v44 = vsel %vm893_vm3, %v1252_v35, 0.0 }
 0x747   : > { %v1266_v45 = vadd.f32 %v1265_v44, %v1264_v36  ;;  %v1766_v36 = vld [vmem:[%s2747_s10] ss:$0 sm:$0xff] }
 0x749   : > { %v1268_v52 = vadd.f32 %v1267_v51, %v1266_v45 }
 0x74b   : > { %v1270_v54 = vadd.f32 %v1269_v53, %v1268_v52 }
 0x74d   : > { %v1271_v56 = vadd.f32 %v1270_v54, %v2465_v11  ;;  %v1975_v11 = vld [vmem:[%s2439_s21] sm:$0xff]  }
 0x74e   : > { %1840 = vmatpush3.bf16.msra.mxu0 %v1975_v11 }
 0x74f   : > { %v2555_v57 = vadd.f32 %v1759_v55, %v1271_v56 }
 0x751   : > { %v1282_v58 = vsel %vm893_vm3, %v2555_v57, 0.0 }
 0x752   : > { %1283 = vadd.xlane.f32.xlu1 %v1282_v58 }
 0x7db   : > { %v1284_v59 = vpop.xlane.xlu1 %1283 }
 0x7dc   : > { %v1285_v60 = vmul.f32 0.03125, %v1284_v59 }
 0x7de   : > { %v1286_v61 = vsub.f32 %v2555_v57, %v1285_v60 }
 0x7e0   : > { %v1287_v62 = vmul.f32 %v1286_v61, %v1286_v61 }
 0x7e2   : > { %v1288_v63 = vsel %vm893_vm3, %v1287_v62, 0.0 }
 0x7e3   : > { %1289 = vadd.xlane.f32.xlu1 %v1288_v63 }
 0x86c   : > { %v1290_v1 = vpop.xlane.xlu1 %1289 }
 0x86d   : > { %v1291_v2 = vmul.f32 0.03125, %v1290_v1 }
 0x86f   : > { %v1292_v3 = vadd.f32 1e-05, %v1291_v2 }
 0x871   : > { %1998 = vrsqrt.f32 %v1292_v3 }
 0x87e   : > { %v1999_v4 = vpop.eup %1998 }
 0x87f   : > { %v1294_v6 = vmul.f32 %v1999_v4, %v1286_v61 }
 0x881   : > { %v1301_v8 = vmul.f32 %v1760_v5, %v1294_v6 }
 0x883   : > { %v1308_v9 = vadd.f32 %v1761_v7, %v1301_v8 }
 0x885   : > { %v1309_v10 = vpack.c.bf16 %v1308_v9, %v1308_v9 }
 0x887   : > { %1842 = vmatmul.mubr.msk.bf16.vlgmr.msra.gmra.mxu0 %vm893_vm3, %v1309_v10 }
 0x947   : > { %v1370_v17 = vpop.f32.mrf.mxu0 }
 0x948   : > { %v1371_v18 = vadd.f32 %v1762_v16, %v1370_v17 }
 0x949   : > { %v1843_v20 = vpop.f32.mrf.mxu0 }
 0x94a   : > { %v1377_v21 = vmul.f32 0.70710677, %v1371_v18  ;;  %v1376_v48 = vmul.f32 0.5, %v1371_v18 }
 0x94b   : > { %v1373_v22 = vpop.f32.mrf.mxu0 }
 0x94c   : > { %v1378_v23 = vand.u32 2147483647, %v1377_v21  ;;  %vm1398_vm7 = vcmp.ge.f32.partialorder %v1377_v21, 0.0 }
 0x94d   : > { %v1844_v24 = vpop.f32.mrf.mxu0 }
 0x94e   : > { %v1379_v25 = vmul.f32 0.3275911, %v1378_v23  ;;  %v1392_v27 = vsub.f32 0.0, %v1378_v23 }
 0x950   : > { %v1380_v26 = vadd.f32 1.0, %v1379_v25  ;;  %v1393_v28 = vmul.f32 %v1392_v27, %v1378_v23 }
 0x952   : > { %2000 = vrcp.f32 %v1380_v26  ;;  %v1394_v30 = vmul.f32 1.442695, %v1393_v28 }
 0x954   : > { %2002 = vpow2.f32 %v1394_v30 }
 0x95f   : > { %v2001_v19 = vpop.eup %2000 }
 0x960   : > { %v1383_v29 = vmul.f32 1.0614054, %v2001_v19 }
 0x961   : > { %v2003_v41 = vpop.eup %2002 }
 0x962   : > { %v1384_v31 = vadd.f32 -1.4531521, %v1383_v29 }
 0x964   : > { %v1385_v32 = vmul.f32 %v2001_v19, %v1384_v31 }
 0x966   : > { %v1386_v33 = vadd.f32 1.4214138, %v1385_v32 }
 0x968   : > { %v1387_v34 = vmul.f32 %v2001_v19, %v1386_v33 }
 0x96a   : > { %v1388_v37 = vadd.f32 -0.28449672, %v1387_v34 }
 0x96c   : > { %v1389_v38 = vmul.f32 %v2001_v19, %v1388_v37 }
 0x96e   : > { %v1390_v39 = vadd.f32 0.2548296, %v1389_v38 }
 0x970   : > { %v1391_v40 = vmul.f32 %v2001_v19, %v1390_v39 }
 0x972   : > { %v1396_v42 = vmul.f32 %v2003_v41, %v1391_v40 }
 0x974   : > { %v1397_v43 = vsub.f32 1.0, %v1396_v42 }
 0x976   : > { %v1399_v46 = vsub.f32 0.0, %v1397_v43 }
 0x978   : > { %v1400_v47 = vsel %vm1398_vm7, %v1397_v43, %v1399_v46 }
 0x979   : > { %v1401_v49 = vadd.f32 1.0, %v1400_v47 }
 0x97b   : > { %v1402_v50 = vmul.f32 %v1401_v49, %v1376_v48 }
 0x97d   : > { %v1403_v35 = vpack.c.bf16 %v1402_v50, %v1402_v50 }
 0x97f   : > { %1854 = vmatmul.mubr.msk.bf16.vlgmr.msra.gmra.mxu1 %vm1443_vm8, %v1403_v35 }
 0xa3f   : > { %v1481_v44 = vpop.f32.mrf.mxu1 }
 0xa40   : > { %v1482_v45 = vadd.f32 %v1766_v36, %v1481_v44 }
 0xa41   : > { %v1855_v51 = vpop.f32.mrf.mxu1  ;;  %1492 = sbr.rel (%p1772_p2) target bundleno = 2940 (0xb7c), region = 108 }
 0xa42   : > { %v1487_v52 = vadd.f32 %v1482_v45, %v2555_v57 }
 0xa43   : > { %v1484_v53 = vpop.f32.mrf.mxu1 }
 0xa44   : > { %1488 = vst.msk [vmem:[#allocation2] sm:$0xff] %vm893_vm3, %v1487_v52 }
 0xa45   : > { %v1856_v54 = vpop.f32.mrf.mxu1 }
 0xa46   : > { %vm1495_vm9 = vcmask 253952   ;;  %v1493_v11 = vld [vmem:[%s2748_s18] sm:$0x1] }
 0xa47   : > { %v1496_v55 = vsel %vm1495_vm9, %v1487_v52, 0.0  ;;  %v1494_v2 = vld [vmem:[%s2749_s3] sm:$0x1] }
 0xa48   : > { %1497 = vadd.xlane.f32.xlu0 %v1496_v55 }
 0xad1   : > { %v1498_v56 = vpop.xlane.xlu0 %1497 }
 0xad2   : > { %v1499_v58 = vmul.f32 0.03125, %v1498_v56 }
 0xad4   : > { %v1500_v59 = vsub.f32 %v1487_v52, %v1499_v58 }
 0xad6   : > { %v1501_v60 = vmul.f32 %v1500_v59, %v1500_v59 }
 0xad8   : > { %v1502_v61 = vsel %vm1495_vm9, %v1501_v60, 0.0 }
 0xad9   : > { %1503 = vadd.xlane.f32.xlu0 %v1502_v61 }
 0xb62   : > { %v1504_v57 = vpop.xlane.xlu0 %1503 }
 0xb63   : > { %v1505_v62 = vmul.f32 0.03125, %v1504_v57 }
 0xb65   : > { %v1506_v63 = vadd.f32 1e-05, %v1505_v62 }
 0xb67   : > { %2004 = vrsqrt.f32 %v1506_v63 }
 0xb74   : > { %v2005_v0 = vpop.eup %2004 }
 0xb75   : > { %v1508_v1 = vmul.f32 %v2005_v0, %v1500_v59 }
 0xb77   : > { %v1509_v3 = vmul.f32 %v1508_v1, %v1493_v11 }
 0xb79   : > { %v1510_v4 = vadd.f32 %v1509_v3, %v1494_v2 }
 0xb7b   : > { %1511 = vst.msk [vmem:[%s2453_s17] sm:$0x1] %vm1495_vm9, %v1510_v4 }
 0xb7c PF: > { %s2750_s22 = sld [smem:[#allocation13_spill]]  ;;  %s1525_s13 = sshll.u32 %s2453_s17, 4  ;;  %s1526_s13 = int_to_ptr.vmem [resolvable:$true] %s1525_s13 }
 0xb7d   : > { %s2752_s27 = sld [smem:[#allocation38_spill]]  ;;  %s2753_s0 = sand.u32 1, %s2118_s30  }
 0xb7e   : > { %s1513_s4 = scalar_lea.sflag [#allocation5], %s2753_s0  ;;  %s2034_s7 = scalar_lea.vmem %s1526_s13, 16 }
 0xb7f   : > { %p2035_p6 = scmp.ne.s32.totalorder %s1526_s13, %s2034_s7  ;;  %s2163_s1 = smov [#allocation6]  }
 0xb80   : > { %s2038_s9 = sshll.u32 %s2163_s1, 4  ;;  %s2039_s9 = int_to_ptr.vmem [resolvable:$false] %s2038_s9 }
 0xb81   : > { %p2036_p7 = pnand %p2035_p6, %p2352_p12  ;;  %s2040_s24 = scalar_lea.vmem %s2039_s9, 32 }
 0xb82   : > { %s1773_s14 = sshll.u32 %s2750_s22, 4  ;;  %p2041_p10 = scmp.lt.s32.totalorder %s1526_s13, %s2039_s9 }
 0xb83   : > { %s1523_s15 = scalar_lea.hbm %s2752_s27, %s1773_s14  ;;  %p2037_p9 = pneg %p2036_p7 }
 0xb84   : > { %p2042_p11 = scmp.lt.s32.totalorder %s2040_s24, %s2034_s7 }
 0xb86   : > { %p2043_p13 = por %p2042_p11, %p2041_p10 }
 0xb88   : > { %p2044_p0 = pnand %p2043_p13, %p2037_p9 }
 0xb8a   : > { %2047 = shalt.err (!%p2044_p0)
}
 0xb8b   : > { %s2048_s21 = scalar_lea.hbm %s1523_s15, 16  ;;  %s2052_s10 = scalar_lea.hbm %s2752_s27, 32 }
 0xb8c   : > { %p2049_p3 = scmp.ne.s32.totalorder %s1523_s15, %s2048_s21  ;;  %p2053_p5 = scmp.lt.s32.totalorder %s1523_s15, %s2752_s27 }
 0xb8d   : > { %p2054_p8 = scmp.lt.s32.totalorder %s2052_s10, %s2048_s21 }
 0xb8e   : > { %p2050_p1 = pnand %p2049_p3, %p2352_p12 }
 0xb8f   : > { %p2055_p2 = por %p2054_p8, %p2053_p5 }
 0xb90   : > { %p2051_p4 = pneg %p2050_p1 }
 0xb92   : > { %p2056_p6 = pnand %p2055_p2, %p2051_p4 }
 0xb94   : > { %2059 = shalt.err (!%p2056_p6)
}
 0xb95   : > { %1861 = dma.vmem_to_hbm [thread:$0]  (%p2352_p12), %s1526_s13, 16, %s1523_s15, %s1513_s4  }
 0xb96 PF: > { %s2754_s18 = sld [smem:[#allocation16_spill]] }
 0xb97   : > { %s2755_s16 = sld [smem:[#allocation9_spill]] }
 0xb98   : > { %s2756_s20 = sld [smem:[#allocation22_spill]] }
 0xb9c   : > { %p1872_p7 = scmp.ge.s32.totalorder %s2754_s18, 2 }
 0xb9d   : > { %s1537_s3 = sand.u32 1, %s2755_s16  }
 0xb9e   : > { %p2757_p9 = scmp.ne.s32.totalorder %s2756_s20, 0  ;;  %s1538_s22 = scalar_lea.sflag [#allocation5], %s1537_s3 }
 0xba0   : > { %p1868_p10 = pnand %p1872_p7, %p2757_p9 }
 0xba2   : > { %p1869_p11 = pneg %p1868_p10 }
 0xba4   : > { %2109 = dma.done.wait (%p1869_p11), %s1538_s22, 16  }
 0xba5   : > { %2111 = vsyncadd (%p1869_p11), %s1538_s22, 4294967280  ;;  %s35_s3 = sadd.s32 1, %s2754_s18   ;;  %s2758_s14 = sld [smem:[#allocation10_spill]] }
 0xba6   : > { %p32_p13 = scmp.ge.s32.totalorder %s35_s3, 6   ;;  %s2759_s20 = sld [smem:[#allocation20_spill]] }
 0xba7   : > { %s2760_s21 = sld [smem:[#allocation11_spill]]  ;;  %s2767_s0 = smov %s2118_s30 }
 0xba8   : > { %s2761_s1 = sld [smem:[#allocation12_spill]] }
 0xba9   : > { %s2762_s22 = sld [smem:[#allocation19_spill]]  ;;  %34 = sbr.rel (!%p32_p13) target bundleno = 25 (0x19), region = 185 }
 0xbaa   : > { %s2763_s2 = sld [smem:[#allocation14_spill]] }
 0xbab   : > { %s2764_s23 = sld [smem:[#allocation15_spill]]  ;;  %s2768_s30 = smov %s2758_s14 }
 0xbac   : > { %s2765_s24 = sld [smem:[#allocation17_spill]] }
 0xbad   : > { %s2766_s25 = sld [smem:[#allocation18_spill]] }
 0xbae   :  { %1542 = vsyncpa [#allocation4], 1 }
 0xbaf   :  { %1544 = vsyncpa [#allocation4 + $0x1], 1 }
 0xbb0   :  { %1545 = vsyncpa [#allocation5], 1 }
 0xbb1   :  { %1547 = vsyncpa [#allocation5 + $0x1], 1 }

</bundles_post_ra>
